<compile_context>
chip_gen: v6e
topology: v6e:2x2x1
jax: 0.10.0
libtpu: 0.0.40
codegen_flags: <defaults>
</compile_context>

<pallas_src>
import functools
import math

import jax
import jax.numpy as jnp
from jax.experimental import pallas as pl
from jax.experimental.pallas import tpu as pltpu

LN_EPS = 1e-5  # torch.nn.LayerNorm default eps

# Parameters shipped to the kernel (after host-side folding).
KERNEL_PARAM_ORDER = [
    "wq", "wk", "wv", "hi", "hi_t", "wo",
    "wf1", "bf1", "wf2",
    "fg_chem_t", "wd1", "wd2", "bd2", "w_chain", "wop_eye",
    "bvecs",
]

# Row indices of the packed [9, H] bias / LayerNorm-vector operand.
_BQ, _BK, _BV, _BO, _BF2, _BD1, _BCH, _NG, _NB = range(9)


def _fga_kernel(x_ref,
                wq_ref, wk_ref, wv_ref, hi_ref, hit_ref, wo_ref,
                wf1_ref, bf1_ref, wf2_ref,
                fgc_ref, wd1_ref, wd2_ref, bd2_ref, wch_ref, wop_ref,
                bvec_ref,
                out_ref, *, num_heads):
    x3 = x_ref[...]                                   # [M, TB, H]
    M, TB, H = x3.shape
    NH = num_heads
    MB = M * TB
    x = x3.reshape(MB, H)                             # leading-dim merge (relayout-free)

    bvecs = bvec_ref[...]                             # [9, H] packed f32 vectors
    bv = lambda i: bvecs[i:i + 1, :]                  # [1, H]

    def ln(v, gamma=None, beta=None):
        # One-pass variance: the two lane reductions are independent, so they
        # can overlap on the XLU instead of serializing reduce->sub->sq->reduce.
        mu = jnp.mean(v, axis=-1, keepdims=True)
        ms = jnp.mean(v * v, axis=-1, keepdims=True)
        var = jnp.maximum(ms - mu * mu, 0.0)
        y = (v - mu) * jax.lax.rsqrt(var + LN_EPS)
        if gamma is not None:
            y = y * gamma + beta
        return y

    def lin(a, w_ref, bias=None):
        # Activations cast to the weight dtype (f32 or bf16); f32 accumulation.
        y = jnp.dot(a.astype(w_ref.dtype), w_ref[...],
                    preferred_element_type=jnp.float32)
        return y if bias is None else y + bias

    def sigmoid(z):
        # sigmoid(z) == 0.5*(1 + tanh(z/2)) exactly; tanh runs on the EUP slot.
        return 0.5 * (1.0 + jnp.tanh(0.5 * z))

    def gelu(z):
        # tanh-based GELU (EUP); |err| ~1e-3 vs exact erf GELU.
        c = math.sqrt(2.0 / math.pi)
        return 0.5 * z * (1.0 + jnp.tanh(c * (z + 0.044715 * z * z * z)))

    # ---- ChemicalAwareAttention.cross_modal_attention -----------------------
    # LN1 affine and 1/sqrt(head_dim) are folded into wq/wk/wv and their biases.
    normed = ln(x)
    q = lin(normed, wq_ref, bv(_BQ))
    k = lin(normed, wk_ref, bv(_BK))
    v = lin(normed, wv_ref, bv(_BV))
    q3 = q.reshape(M, TB, H)
    k3 = k.reshape(M, TB, H)
    v3 = v.reshape(M, TB, H)

    # Per-head scores without splitting the lane dim: elementwise q*k at full
    # 128-lane density, then ONE MXU matmul against the block-diagonal head
    # indicator HI [H, NH] to sum within each head.
    prods = (q3[:, None] * k3[None, :]).reshape(M * M * TB, H)
    s = lin(prods, hi_ref).reshape(M, M, TB, NH)      # [q-mod, k-mod, TB, heads]
    mx = jnp.max(s, axis=1, keepdims=True)            # softmax over key modality
    es = jnp.exp(s - mx)
    inv = pl.reciprocal(jnp.sum(es, axis=1, keepdims=True), approx=True)  # EUP
    w = (es * inv).reshape(M * M * TB, NH)
    # Expand per-head weights back to lane width via HI^T, then weight v.
    wexp = lin(w, hit_ref).reshape(M, M, TB, H)
    attended = jnp.sum(wexp * v3[None], axis=1).reshape(MB, H)

    attn_out = lin(attended, wo_ref, bv(_BO)) + x     # residual 1
    # LN2 affine folded into wf1/bf1 on the host.
    ff = lin(gelu(lin(ln(attn_out), wf1_ref, bf1_ref[...])), wf2_ref, bv(_BF2))
    enhanced = attn_out + ff                          # residual 2

    # ---- ChemicalAwareAttention.apply_chemical_priors ------------------------
    # 1/sqrt(H) folded into fg_chem_t; sigmoid is monotonic => sigmoid(max)==max(sigmoid).
    rel = sigmoid(jnp.max(lin(x, fgc_ref), axis=-1, keepdims=True))   # [MB, 1]
    base = x + rel * (enhanced - x)

    # ---- FunctionalGroupAttention (single-key MHA chain folded into w_chain) -
    det = sigmoid(lin(gelu(lin(x, wd1_ref, bv(_BD1))), wd2_ref, bd2_ref[...]))
    # mean over modalities folded into w_chain (1/M); fg_term is query-independent.
    fg_term = lin(jnp.sum(det.reshape(M, TB, -1), axis=0), wch_ref, bv(_BCH))  # [TB, H]

    # ---- output projection (+ identity residual folded into wop_eye) + LN ----
    pre = lin(base, wop_ref).reshape(M, TB, H) + fg_term[None]
    out_ref[...] = ln(pre, bv(_NG), bv(_NB))          # ONE full-block store


def _fold_kernel_params(p, *, num_heads, num_modalities, matmul_dtype):
    """Host-side exact constant folding of the torch parameters."""
    H = p["wq"].shape[0]
    HD = H // num_heads
    M = num_modalities

    n1g_col = p["n1g"].reshape(H, 1)
    n2g_col = p["n2g"].reshape(H, 1)

    qs = 1.0 / math.sqrt(HD)
    wq = n1g_col * p["wq"] * qs
    bq = (p["n1b"] @ p["wq"] + p["bq"]) * qs
    wk = n1g_col * p["wk"]
    bk = p["n1b"] @ p["wk"] + p["bk"]
    wv = n1g_col * p["wv"]
    bvv = p["n1b"] @ p["wv"] + p["bv"]

    wf1 = n2g_col * p["wf1"]
    bf1 = p["n2b"] @ p["wf1"] + p["bf1"]

    # Block-diagonal head indicator for in-kernel per-head reduce / expand.
    head_of_lane = jnp.arange(H) // HD
    hi = (head_of_lane[:, None] == jnp.arange(num_heads)[None, :]).astype(jnp.float32)

    fg_chem_t = p["fg_chem"].T * (1.0 / math.sqrt(H))

    wv_in = p["w_in"][:, 2 * H:3 * H]
    bv_in = p["b_in"][:, 2 * H:3 * H]
    wop_top = p["wop"][:H]
    wop_bot = p["wop"][H:]
    # Single-key MHA: softmax over one key == 1 -> attended = out_proj(v_proj(wfg)),
    # and only the bottom half of output_proj ever touches it.  1/M (mean over
    # modalities) folded in too.
    w_chain = (p["fg_emb"] @ wv_in @ p["w_mo"] @ wop_bot) * (1.0 / M)
    b_chain = (bv_in @ p["w_mo"] + p["b_mo"]) @ wop_bot + p["bop"]
    # base @ wop_top + base == base @ (wop_top + I)
    wop_eye = wop_top + jnp.eye(H, dtype=jnp.float32)

    bvecs = jnp.concatenate(
        [bq, bk, bvv, p["bo"], p["bf2"], p["bd1"], b_chain, p["ng"], p["nb"]],
        axis=0)                                                       # [9, H]

    c = lambda a: a.astype(matmul_dtype)
    return dict(
        wq=c(wq), wk=c(wk), wv=c(wv), hi=c(hi), hi_t=c(hi.T), wo=c(p["wo"]),
        wf1=c(wf1), bf1=bf1.astype(jnp.float32), wf2=c(p["wf2"]),
        fg_chem_t=c(fg_chem_t), wd1=c(p["wd1"]), wd2=c(p["wd2"]),
        bd2=p["bd2"].astype(jnp.float32),
        w_chain=c(w_chain), wop_eye=c(wop_eye),
        bvecs=bvecs.astype(jnp.float32))


def _default_batch_tile(B):
    # v7x has 2 TensorCores: make sure there are >=2 grid steps when the batch
    # allows it (and keep tiles modest so input/output DMA pipelines under
    # compute and the per-step live set stays well inside 64 MiB VMEM).
    if B < 16 or B % 16 != 0:
        return B
    tb = B // 2
    while tb > 512 and tb % 16 == 0:
        tb //= 2
    return tb


def _vmem_estimate_bytes(M, tb, H, plist):
    rows = M * tb
    act = rows * H * 4 * (10 + 3 * M)          # qkv, prods/wexp stacks, residuals
    act += rows * 4 * H * 4 * 2                # FFN hidden (GELU in/out)
    weights = 2 * sum(int(p.size) * p.dtype.itemsize for p in plist)
    io = 2 * 2 * rows * H * 4                  # x + out tiles, double buffered
    return int(1.3 * (act + weights + io))


def functional_group_attention(feature_list, params, *, num_heads=4,
                               batch_tile=None, vmem_limit_bytes=None,
                               matmul_dtype=jnp.float32):
    """Stacks features to [M, B, H], folds constants, runs the fused kernel.

    matmul_dtype: pass jnp.bfloat16 on v6e/v7x for ~2x MXU rate and half the
    weight DMA bytes (LN/softmax stay f32); keep f32 for strict parity / v5e.
    """
    x = jnp.stack(feature_list, axis=0).astype(jnp.float32)   # [M, B, H]
    M, B, H = x.shape
    assert H % num_heads == 0, "hidden_dim must be divisible by num_heads"
    tb = batch_tile if batch_tile is not None else _default_batch_tile(B)
    assert B % tb == 0
    assert tb == B or tb % 8 == 0, "batch_tile must be B or a multiple of 8"

    kp = _fold_kernel_params(params, num_heads=num_heads, num_modalities=M,
                             matmul_dtype=matmul_dtype)
    plist = [kp[k] for k in KERNEL_PARAM_ORDER]

    n_steps = B // tb
    # Constants have an invariant index_map (never re-DMA'd); on multi-step
    # grids drop them to a single buffer to halve their VMEM footprint.
    pmode = pl.Buffered(1) if n_steps > 1 else None

    def const_spec(p):
        nd = p.ndim
        idx = lambda b, _nd=nd: (0,) * _nd
        if pmode is None:
            return pl.BlockSpec(p.shape, idx)
        return pl.BlockSpec(p.shape, idx, pipeline_mode=pmode)

    in_specs = [pl.BlockSpec((M, tb, H), lambda b: (0, b, 0))]
    in_specs += [const_spec(p) for p in plist]

    cp_kwargs = dict(dimension_semantics=("parallel",))
    if vmem_limit_bytes is None:
        est = _vmem_estimate_bytes(M, tb, H, plist)
        if est > (16 << 20):               # v5e scoped-VMEM default is only 16 MiB
            vmem_limit_bytes = min(est, 64 << 20)   # cap at v7x physical VMEM
    if vmem_limit_bytes is not None:
        cp_kwargs["vmem_limit_bytes"] = int(vmem_limit_bytes)

    out = pl.pallas_call(
        functools.partial(_fga_kernel, num_heads=num_heads),
        out_shape=jax.ShapeDtypeStruct((M, B, H), jnp.float32),
        grid_spec=pltpu.PrefetchScalarGridSpec(
            num_scalar_prefetch=0,
            grid=(n_steps,),
            in_specs=in_specs,
            out_specs=pl.BlockSpec((M, tb, H), lambda b: (0, b, 0)),
        ),
        compiler_params=pltpu.CompilerParams(**cp_kwargs),
    )(x, *plist)
    return [out[i] for i in range(M)]


def init_params(key, H, num_fg, chem_groups=64):
    """Deterministic synthetic parameters (shapes follow the torch __init__)."""
    ks = iter(jax.random.split(key, 48))

    def w(shape, scale=0.08):
        return (scale * jax.random.normal(next(ks), shape)).astype(jnp.float32)

    def b(n):
        return (0.02 * jax.random.normal(next(ks), (1, n))).astype(jnp.float32)

    def gamma(n):   # non-trivial LN affines so the host-side folds are exercised
        return (1.0 + 0.1 * jax.random.normal(next(ks), (1, n))).astype(jnp.float32)

    def beta(n):
        return (0.05 * jax.random.normal(next(ks), (1, n))).astype(jnp.float32)

    return dict(
        # ChemicalAwareAttention
        n1g=gamma(H), n1b=beta(H),
        wq=w((H, H)), bq=b(H), wk=w((H, H)), bk=b(H), wv=w((H, H)), bv=b(H),
        wo=w((H, H)), bo=b(H),
        n2g=gamma(H), n2b=beta(H),
        wf1=w((H, 4 * H)), bf1=b(4 * H), wf2=w((4 * H, H)), bf2=b(H),
        fg_chem=w((chem_groups, H), scale=1.0),   # torch.randn(64, hidden_dim)
        # FunctionalGroupAttention
        wd1=w((H, H)), bd1=b(H), wd2=w((H, num_fg)), bd2=b(num_fg),
        fg_emb=w((num_fg, H), scale=1.0),          # torch.randn(num_fg, hidden_dim)
        w_in=w((H, 3 * H)), b_in=b(3 * H),         # MHA in_proj (transposed)
        w_mo=w((H, H)), b_mo=b(H),                 # MHA out_proj
        wop=w((2 * H, H)), bop=b(H),
        ng=gamma(H), nb=beta(H),
    )


def _reference(x, p, num_heads):
    """Pure-JAX reference of the PyTorch forward (eval mode), x is [B, M, H]."""
    B, M, H = x.shape
    hd = H // num_heads
    gelu = lambda z: jax.nn.gelu(z, approximate=False)   # torch exact GELU

    def ln(v, g, b):
        mu = v.mean(-1, keepdims=True)
        var = jnp.square(v - mu).mean(-1, keepdims=True)
        return (v - mu) / jnp.sqrt(var + LN_EPS) * g + b

    normed = ln(x, p["n1g"], p["n1b"])
    q = normed @ p["wq"] + p["bq"]
    k = normed @ p["wk"] + p["bk"]
    v = normed @ p["wv"] + p["bv"]
    split = lambda t: t.reshape(B, M, num_heads, hd).transpose(0, 2, 1, 3)
    qh, kh, vh = split(q), split(k), split(v)
    a = jax.nn.softmax(qh @ jnp.swapaxes(kh, -1, -2) / math.sqrt(hd), axis=-1)
    att = (a @ vh).transpose(0, 2, 1, 3).reshape(B, M, H)
    out = att @ p["wo"] + p["bo"] + x
    ff = gelu(ln(out, p["n2g"], p["n2b"]) @ p["wf1"] + p["bf1"]) @ p["wf2"] + p["bf2"]
    enhanced = out + ff

    sim = jax.nn.sigmoid(jnp.einsum("bmh,gh->bmg", x, p["fg_chem"]) / math.sqrt(H))
    rel = sim.max(-1, keepdims=True)
    base = x + rel * (enhanced - x)

    det = jax.nn.sigmoid(gelu(x @ p["wd1"] + p["bd1"]) @ p["wd2"] + p["bd2"])
    wfg = det.mean(1) @ p["fg_emb"]
    v_mha = wfg @ p["w_in"][:, 2 * H:] + p["b_in"][:, 2 * H:]
    attended = v_mha @ p["w_mo"] + p["b_mo"]

    outs = []
    for i in range(M):
        feat = base[:, i]
        enh = jnp.concatenate([feat, attended], -1) @ p["wop"] + p["bop"]
        outs.append(ln(enh + feat, p["ng"], p["nb"]))
    return jnp.stack(outs, axis=1)


if __name__ == "__main__":
    B, H, M = 8, 32, 3          # batch, hidden_dim, num_modalities
    NUM_HEADS, NUM_FG = 4, 32

    key = jax.random.PRNGKey(0)
    kx, kp = jax.random.split(key)
    feats = [jax.random.normal(k, (B, H), jnp.float32)
             for k in jax.random.split(kx, M)]
    params = init_params(kp, H, NUM_FG)

    refs = _reference(jnp.stack(feats, axis=1), params, NUM_HEADS)

    # f32 matmul path (strict parity check; default).
    outs = functional_group_attention(feats, params, num_heads=NUM_HEADS)
    outs = [jax.block_until_ready(o) for o in outs]
    assert all(bool(jnp.all(jnp.isfinite(o))) for o in outs)
    err = max(float(jnp.max(jnp.abs(o - refs[:, i]))) for i, o in enumerate(outs))
    assert err < 5e-2, f"f32 max abs error vs reference: {err}"

    # bf16 matmul path (production default on v6e/v7x MXU); looser parity bar.
    outs_bf16 = functional_group_attention(feats, params, num_heads=NUM_HEADS,
                                           matmul_dtype=jnp.bfloat16)
    outs_bf16 = [jax.block_until_ready(o) for o in outs_bf16]
    err_bf16 = max(float(jnp.max(jnp.abs(o - refs[:, i])))
                   for i, o in enumerate(outs_bf16))
    assert err_bf16 < 2e-1, f"bf16 max abs error vs reference: {err_bf16}"

    print("KERNEL_OK")
</pallas_src>

<mosaic_0001>
module attributes {stable_mosaic.version = 11 : i64} {
  func.func @_fga_kernel(%arg0: i32, %arg1: memref<3x8x32xf32, #tpu.memory_space<vmem>>, %arg2: memref<32x32xf32, #tpu.memory_space<vmem>>, %arg3: memref<32x32xf32, #tpu.memory_space<vmem>>, %arg4: memref<32x32xf32, #tpu.memory_space<vmem>>, %arg5: memref<32x4xf32, #tpu.memory_space<vmem>>, %arg6: memref<4x32xf32, #tpu.memory_space<vmem>>, %arg7: memref<32x32xf32, #tpu.memory_space<vmem>>, %arg8: memref<32x128xf32, #tpu.memory_space<vmem>>, %arg9: memref<1x128xf32, #tpu.memory_space<vmem>>, %arg10: memref<128x32xf32, #tpu.memory_space<vmem>>, %arg11: memref<32x64xf32, #tpu.memory_space<vmem>>, %arg12: memref<32x32xf32, #tpu.memory_space<vmem>>, %arg13: memref<32x32xf32, #tpu.memory_space<vmem>>, %arg14: memref<1x32xf32, #tpu.memory_space<vmem>>, %arg15: memref<32x32xf32, #tpu.memory_space<vmem>>, %arg16: memref<32x32xf32, #tpu.memory_space<vmem>>, %arg17: memref<9x32xf32, #tpu.memory_space<vmem>>, %arg18: memref<3x8x32xf32, #tpu.memory_space<vmem>>) attributes {dimension_semantics = [#tpu.dimension_semantics<parallel>], iteration_bounds = array<i64: 1>, scalar_prefetch = 0 : i64, scratch_operands = 0 : i64, tpu.core_type = #tpu.core_type<tc>, window_params = [{transform_indices = @transform_0, window_bounds = array<i64: 3, 8, 32>}, {pipeline_mode = #tpu.pipeline_mode<synchronous>, transform_indices = @transform_1, window_bounds = array<i64: 32, 32>}, {pipeline_mode = #tpu.pipeline_mode<synchronous>, transform_indices = @transform_2, window_bounds = array<i64: 32, 32>}, {pipeline_mode = #tpu.pipeline_mode<synchronous>, transform_indices = @transform_3, window_bounds = array<i64: 32, 32>}, {pipeline_mode = #tpu.pipeline_mode<synchronous>, transform_indices = @transform_4, window_bounds = array<i64: 32, 4>}, {pipeline_mode = #tpu.pipeline_mode<synchronous>, transform_indices = @transform_5, window_bounds = array<i64: 4, 32>}, {pipeline_mode = #tpu.pipeline_mode<synchronous>, transform_indices = @transform_6, window_bounds = array<i64: 32, 32>}, {pipeline_mode = #tpu.pipeline_mode<synchronous>, transform_indices = @transform_7, window_bounds = array<i64: 32, 128>}, {pipeline_mode = #tpu.pipeline_mode<synchronous>, transform_indices = @transform_8, window_bounds = array<i64: 1, 128>}, {pipeline_mode = #tpu.pipeline_mode<synchronous>, transform_indices = @transform_9, window_bounds = array<i64: 128, 32>}, {pipeline_mode = #tpu.pipeline_mode<synchronous>, transform_indices = @transform_10, window_bounds = array<i64: 32, 64>}, {pipeline_mode = #tpu.pipeline_mode<synchronous>, transform_indices = @transform_11, window_bounds = array<i64: 32, 32>}, {pipeline_mode = #tpu.pipeline_mode<synchronous>, transform_indices = @transform_12, window_bounds = array<i64: 32, 32>}, {pipeline_mode = #tpu.pipeline_mode<synchronous>, transform_indices = @transform_13, window_bounds = array<i64: 1, 32>}, {pipeline_mode = #tpu.pipeline_mode<synchronous>, transform_indices = @transform_14, window_bounds = array<i64: 32, 32>}, {pipeline_mode = #tpu.pipeline_mode<synchronous>, transform_indices = @transform_15, window_bounds = array<i64: 32, 32>}, {pipeline_mode = #tpu.pipeline_mode<synchronous>, transform_indices = @transform_16, window_bounds = array<i64: 9, 32>}, {transform_indices = @transform_17, window_bounds = array<i64: 3, 8, 32>}]} {
    %c0 = arith.constant 0 : index
    %c0_0 = arith.constant 0 : index
    %c0_1 = arith.constant 0 : index
    %0 = vector.load %arg1[%c0, %c0_0, %c0_1] : memref<3x8x32xf32, #tpu.memory_space<vmem>>, vector<3x8x32xf32>
    %1 = vector.shape_cast %0 : vector<3x8x32xf32> to vector<24x32xf32>
    %c0_2 = arith.constant 0 : index
    %c0_3 = arith.constant 0 : index
    %2 = vector.load %arg17[%c0_2, %c0_3] : memref<9x32xf32, #tpu.memory_space<vmem>>, vector<9x32xf32>
    %cst = arith.constant dense<0.000000e+00> : vector<24xf32>
    %3 = vector.multi_reduction <add>, %1, %cst [1] : vector<24x32xf32> to vector<24xf32>
    %4 = vector.shape_cast %3 : vector<24xf32> to vector<24x1xf32>
    %cst_4 = arith.constant 3.200000e+01 : f32
    %5 = vector.broadcast %cst_4 : f32 to vector<24x1xf32>
    %6 = arith.divf %4, %5 : vector<24x1xf32>
    %7 = arith.mulf %1, %1 : vector<24x32xf32>
    %cst_5 = arith.constant dense<0.000000e+00> : vector<24xf32>
    %8 = vector.multi_reduction <add>, %7, %cst_5 [1] : vector<24x32xf32> to vector<24xf32>
    %9 = vector.shape_cast %8 : vector<24xf32> to vector<24x1xf32>
    %cst_6 = arith.constant 3.200000e+01 : f32
    %10 = vector.broadcast %cst_6 : f32 to vector<24x1xf32>
    %11 = arith.divf %9, %10 : vector<24x1xf32>
    %12 = arith.mulf %6, %6 : vector<24x1xf32>
    %13 = arith.subf %11, %12 : vector<24x1xf32>
    %cst_7 = arith.constant 0.000000e+00 : f32
    %14 = vector.broadcast %cst_7 : f32 to vector<24x1xf32>
    %15 = arith.maximumf %13, %14 : vector<24x1xf32>
    %16 = vector.broadcast %6 : vector<24x1xf32> to vector<24x32xf32>
    %17 = arith.subf %1, %16 : vector<24x32xf32>
    %cst_8 = arith.constant 9.99999974E-6 : f32
    %18 = vector.broadcast %cst_8 : f32 to vector<24x1xf32>
    %19 = arith.addf %15, %18 : vector<24x1xf32>
    %20 = math.rsqrt %19 : vector<24x1xf32>
    %21 = vector.broadcast %20 : vector<24x1xf32> to vector<24x32xf32>
    %22 = arith.mulf %17, %21 : vector<24x32xf32>
    %23 = vector.extract_strided_slice %2 {offsets = [0, 0], sizes = [1, 32], strides = [1, 1]} : vector<9x32xf32> to vector<1x32xf32>
    %c0_9 = arith.constant 0 : index
    %c0_10 = arith.constant 0 : index
    %24 = vector.load %arg2[%c0_9, %c0_10] : memref<32x32xf32, #tpu.memory_space<vmem>>, vector<32x32xf32>
    %cst_11 = arith.constant dense<0.000000e+00> : vector<24x32xf32>
    %25 = tpu.matmul %22, %24, %cst_11 {dimension_numbers = #tpu.dot_dimension_numbers<[1], [0], [0], [1], [0, 0, 1, 1], [], []>} : vector<24x32xf32>, vector<32x32xf32>, vector<24x32xf32> -> vector<24x32xf32>
    %26 = vector.broadcast %23 : vector<1x32xf32> to vector<24x32xf32>
    %27 = arith.addf %25, %26 : vector<24x32xf32>
    %28 = vector.extract_strided_slice %2 {offsets = [1, 0], sizes = [1, 32], strides = [1, 1]} : vector<9x32xf32> to vector<1x32xf32>
    %c0_12 = arith.constant 0 : index
    %c0_13 = arith.constant 0 : index
    %29 = vector.load %arg3[%c0_12, %c0_13] : memref<32x32xf32, #tpu.memory_space<vmem>>, vector<32x32xf32>
    %cst_14 = arith.constant dense<0.000000e+00> : vector<24x32xf32>
    %30 = tpu.matmul %22, %29, %cst_14 {dimension_numbers = #tpu.dot_dimension_numbers<[1], [0], [0], [1], [0, 0, 1, 1], [], []>} : vector<24x32xf32>, vector<32x32xf32>, vector<24x32xf32> -> vector<24x32xf32>
    %31 = vector.broadcast %28 : vector<1x32xf32> to vector<24x32xf32>
    %32 = arith.addf %30, %31 : vector<24x32xf32>
    %33 = vector.extract_strided_slice %2 {offsets = [2, 0], sizes = [1, 32], strides = [1, 1]} : vector<9x32xf32> to vector<1x32xf32>
    %c0_15 = arith.constant 0 : index
    %c0_16 = arith.constant 0 : index
    %34 = vector.load %arg4[%c0_15, %c0_16] : memref<32x32xf32, #tpu.memory_space<vmem>>, vector<32x32xf32>
    %cst_17 = arith.constant dense<0.000000e+00> : vector<24x32xf32>
    %35 = tpu.matmul %22, %34, %cst_17 {dimension_numbers = #tpu.dot_dimension_numbers<[1], [0], [0], [1], [0, 0, 1, 1], [], []>} : vector<24x32xf32>, vector<32x32xf32>, vector<24x32xf32> -> vector<24x32xf32>
    %36 = vector.broadcast %33 : vector<1x32xf32> to vector<24x32xf32>
    %37 = arith.addf %35, %36 : vector<24x32xf32>
    %38 = vector.shape_cast %27 : vector<24x32xf32> to vector<3x8x32xf32>
    %39 = vector.shape_cast %32 : vector<24x32xf32> to vector<3x8x32xf32>
    %40 = vector.shape_cast %37 : vector<24x32xf32> to vector<3x8x32xf32>
    %41 = vector.shape_cast %38 : vector<3x8x32xf32> to vector<3x1x8x32xf32>
    %42 = vector.shape_cast %39 : vector<3x8x32xf32> to vector<1x3x8x32xf32>
    %43 = vector.broadcast %41 : vector<3x1x8x32xf32> to vector<3x3x8x32xf32>
    %44 = vector.broadcast %42 : vector<1x3x8x32xf32> to vector<3x3x8x32xf32>
    %45 = arith.mulf %43, %44 : vector<3x3x8x32xf32>
    %46 = vector.shape_cast %45 : vector<3x3x8x32xf32> to vector<72x32xf32>
    %c0_18 = arith.constant 0 : index
    %c0_19 = arith.constant 0 : index
    %47 = vector.load %arg5[%c0_18, %c0_19] : memref<32x4xf32, #tpu.memory_space<vmem>>, vector<32x4xf32>
    %cst_20 = arith.constant dense<0.000000e+00> : vector<72x4xf32>
    %48 = tpu.matmul %46, %47, %cst_20 {dimension_numbers = #tpu.dot_dimension_numbers<[1], [0], [0], [1], [0, 0, 1, 1], [], []>} : vector<72x32xf32>, vector<32x4xf32>, vector<72x4xf32> -> vector<72x4xf32>
    %49 = vector.shape_cast %48 : vector<72x4xf32> to vector<3x3x8x4xf32>
    %cst_21 = arith.constant dense<0xFF800000> : vector<3x8x4xf32>
    %50 = vector.multi_reduction <maximumf>, %49, %cst_21 [1] : vector<3x3x8x4xf32> to vector<3x8x4xf32>
    %51 = vector.shape_cast %50 : vector<3x8x4xf32> to vector<3x1x8x4xf32>
    %52 = vector.broadcast %51 : vector<3x1x8x4xf32> to vector<3x3x8x4xf32>
    %53 = arith.subf %49, %52 : vector<3x3x8x4xf32>
    %54 = math.exp %53 : vector<3x3x8x4xf32>
    %cst_22 = arith.constant dense<0.000000e+00> : vector<3x8x4xf32>
    %55 = vector.multi_reduction <add>, %54, %cst_22 [1] : vector<3x3x8x4xf32> to vector<3x8x4xf32>
    %56 = vector.shape_cast %55 : vector<3x8x4xf32> to vector<3x1x8x4xf32>
    %57 = tpu.reciprocal %56 {approx = true} : vector<3x1x8x4xf32> -> vector<3x1x8x4xf32>
    %58 = vector.broadcast %57 : vector<3x1x8x4xf32> to vector<3x3x8x4xf32>
    %59 = arith.mulf %54, %58 : vector<3x3x8x4xf32>
    %60 = vector.shape_cast %59 : vector<3x3x8x4xf32> to vector<72x4xf32>
    %c0_23 = arith.constant 0 : index
    %c0_24 = arith.constant 0 : index
    %61 = vector.load %arg6[%c0_23, %c0_24] : memref<4x32xf32, #tpu.memory_space<vmem>>, vector<4x32xf32>
    %cst_25 = arith.constant dense<0.000000e+00> : vector<72x32xf32>
    %62 = tpu.matmul %60, %61, %cst_25 {dimension_numbers = #tpu.dot_dimension_numbers<[1], [0], [0], [1], [0, 0, 1, 1], [], []>} : vector<72x4xf32>, vector<4x32xf32>, vector<72x32xf32> -> vector<72x32xf32>
    %63 = vector.shape_cast %62 : vector<72x32xf32> to vector<3x3x8x32xf32>
    %64 = vector.shape_cast %40 : vector<3x8x32xf32> to vector<1x3x8x32xf32>
    %65 = vector.broadcast %64 : vector<1x3x8x32xf32> to vector<3x3x8x32xf32>
    %66 = arith.mulf %63, %65 : vector<3x3x8x32xf32>
    %cst_26 = arith.constant dense<0.000000e+00> : vector<3x8x32xf32>
    %67 = vector.multi_reduction <add>, %66, %cst_26 [1] : vector<3x3x8x32xf32> to vector<3x8x32xf32>
    %68 = vector.shape_cast %67 : vector<3x8x32xf32> to vector<24x32xf32>
    %69 = vector.extract_strided_slice %2 {offsets = [3, 0], sizes = [1, 32], strides = [1, 1]} : vector<9x32xf32> to vector<1x32xf32>
    %c0_27 = arith.constant 0 : index
    %c0_28 = arith.constant 0 : index
    %70 = vector.load %arg7[%c0_27, %c0_28] : memref<32x32xf32, #tpu.memory_space<vmem>>, vector<32x32xf32>
    %cst_29 = arith.constant dense<0.000000e+00> : vector<24x32xf32>
    %71 = tpu.matmul %68, %70, %cst_29 {dimension_numbers = #tpu.dot_dimension_numbers<[1], [0], [0], [1], [0, 0, 1, 1], [], []>} : vector<24x32xf32>, vector<32x32xf32>, vector<24x32xf32> -> vector<24x32xf32>
    %72 = vector.broadcast %69 : vector<1x32xf32> to vector<24x32xf32>
    %73 = arith.addf %71, %72 : vector<24x32xf32>
    %74 = arith.addf %73, %1 : vector<24x32xf32>
    %cst_30 = arith.constant dense<0.000000e+00> : vector<24xf32>
    %75 = vector.multi_reduction <add>, %74, %cst_30 [1] : vector<24x32xf32> to vector<24xf32>
    %76 = vector.shape_cast %75 : vector<24xf32> to vector<24x1xf32>
    %cst_31 = arith.constant 3.200000e+01 : f32
    %77 = vector.broadcast %cst_31 : f32 to vector<24x1xf32>
    %78 = arith.divf %76, %77 : vector<24x1xf32>
    %79 = arith.mulf %74, %74 : vector<24x32xf32>
    %cst_32 = arith.constant dense<0.000000e+00> : vector<24xf32>
    %80 = vector.multi_reduction <add>, %79, %cst_32 [1] : vector<24x32xf32> to vector<24xf32>
    %81 = vector.shape_cast %80 : vector<24xf32> to vector<24x1xf32>
    %cst_33 = arith.constant 3.200000e+01 : f32
    %82 = vector.broadcast %cst_33 : f32 to vector<24x1xf32>
    %83 = arith.divf %81, %82 : vector<24x1xf32>
    %84 = arith.mulf %78, %78 : vector<24x1xf32>
    %85 = arith.subf %83, %84 : vector<24x1xf32>
    %cst_34 = arith.constant 0.000000e+00 : f32
    %86 = vector.broadcast %cst_34 : f32 to vector<24x1xf32>
    %87 = arith.maximumf %85, %86 : vector<24x1xf32>
    %88 = vector.broadcast %78 : vector<24x1xf32> to vector<24x32xf32>
    %89 = arith.subf %74, %88 : vector<24x32xf32>
    %cst_35 = arith.constant 9.99999974E-6 : f32
    %90 = vector.broadcast %cst_35 : f32 to vector<24x1xf32>
    %91 = arith.addf %87, %90 : vector<24x1xf32>
    %92 = math.rsqrt %91 : vector<24x1xf32>
    %93 = vector.broadcast %92 : vector<24x1xf32> to vector<24x32xf32>
    %94 = arith.mulf %89, %93 : vector<24x32xf32>
    %c0_36 = arith.constant 0 : index
    %c0_37 = arith.constant 0 : index
    %95 = vector.load %arg9[%c0_36, %c0_37] : memref<1x128xf32, #tpu.memory_space<vmem>>, vector<1x128xf32>
    %c0_38 = arith.constant 0 : index
    %c0_39 = arith.constant 0 : index
    %96 = vector.load %arg8[%c0_38, %c0_39] : memref<32x128xf32, #tpu.memory_space<vmem>>, vector<32x128xf32>
    %cst_40 = arith.constant dense<0.000000e+00> : vector<24x128xf32>
    %97 = tpu.matmul %94, %96, %cst_40 {dimension_numbers = #tpu.dot_dimension_numbers<[1], [0], [0], [1], [0, 0, 1, 1], [], []>} : vector<24x32xf32>, vector<32x128xf32>, vector<24x128xf32> -> vector<24x128xf32>
    %98 = vector.broadcast %95 : vector<1x128xf32> to vector<24x128xf32>
    %99 = arith.addf %97, %98 : vector<24x128xf32>
    %cst_41 = arith.constant 5.000000e-01 : f32
    %100 = vector.broadcast %cst_41 : f32 to vector<24x128xf32>
    %101 = arith.mulf %100, %99 : vector<24x128xf32>
    %cst_42 = arith.constant 4.471500e-02 : f32
    %102 = vector.broadcast %cst_42 : f32 to vector<24x128xf32>
    %103 = arith.mulf %102, %99 : vector<24x128xf32>
    %104 = arith.mulf %103, %99 : vector<24x128xf32>
    %105 = arith.mulf %104, %99 : vector<24x128xf32>
    %106 = arith.addf %99, %105 : vector<24x128xf32>
    %cst_43 = arith.constant 0.797884583 : f32
    %107 = vector.broadcast %cst_43 : f32 to vector<24x128xf32>
    %108 = arith.mulf %107, %106 : vector<24x128xf32>
    %109 = math.tanh %108 : vector<24x128xf32>
    %cst_44 = arith.constant 1.000000e+00 : f32
    %110 = vector.broadcast %cst_44 : f32 to vector<24x128xf32>
    %111 = arith.addf %110, %109 : vector<24x128xf32>
    %112 = arith.mulf %101, %111 : vector<24x128xf32>
    %113 = vector.extract_strided_slice %2 {offsets = [4, 0], sizes = [1, 32], strides = [1, 1]} : vector<9x32xf32> to vector<1x32xf32>
    %c0_45 = arith.constant 0 : index
    %c0_46 = arith.constant 0 : index
    %114 = vector.load %arg10[%c0_45, %c0_46] : memref<128x32xf32, #tpu.memory_space<vmem>>, vector<128x32xf32>
    %cst_47 = arith.constant dense<0.000000e+00> : vector<24x32xf32>
    %115 = tpu.matmul %112, %114, %cst_47 {dimension_numbers = #tpu.dot_dimension_numbers<[1], [0], [0], [1], [0, 0, 1, 1], [], []>} : vector<24x128xf32>, vector<128x32xf32>, vector<24x32xf32> -> vector<24x32xf32>
    %116 = vector.broadcast %113 : vector<1x32xf32> to vector<24x32xf32>
    %117 = arith.addf %115, %116 : vector<24x32xf32>
    %118 = arith.addf %74, %117 : vector<24x32xf32>
    %c0_48 = arith.constant 0 : index
    %c0_49 = arith.constant 0 : index
    %119 = vector.load %arg11[%c0_48, %c0_49] : memref<32x64xf32, #tpu.memory_space<vmem>>, vector<32x64xf32>
    %cst_50 = arith.constant dense<0.000000e+00> : vector<24x64xf32>
    %120 = tpu.matmul %1, %119, %cst_50 {dimension_numbers = #tpu.dot_dimension_numbers<[1], [0], [0], [1], [0, 0, 1, 1], [], []>} : vector<24x32xf32>, vector<32x64xf32>, vector<24x64xf32> -> vector<24x64xf32>
    %cst_51 = arith.constant dense<0xFF800000> : vector<24xf32>
    %121 = vector.multi_reduction <maximumf>, %120, %cst_51 [1] : vector<24x64xf32> to vector<24xf32>
    %122 = vector.shape_cast %121 : vector<24xf32> to vector<24x1xf32>
    %cst_52 = arith.constant 5.000000e-01 : f32
    %123 = vector.broadcast %cst_52 : f32 to vector<24x1xf32>
    %124 = arith.mulf %123, %122 : vector<24x1xf32>
    %125 = math.tanh %124 : vector<24x1xf32>
    %cst_53 = arith.constant 1.000000e+00 : f32
    %126 = vector.broadcast %cst_53 : f32 to vector<24x1xf32>
    %127 = arith.addf %126, %125 : vector<24x1xf32>
    %cst_54 = arith.constant 5.000000e-01 : f32
    %128 = vector.broadcast %cst_54 : f32 to vector<24x1xf32>
    %129 = arith.mulf %128, %127 : vector<24x1xf32>
    %130 = arith.subf %118, %1 : vector<24x32xf32>
    %131 = vector.broadcast %129 : vector<24x1xf32> to vector<24x32xf32>
    %132 = arith.mulf %131, %130 : vector<24x32xf32>
    %133 = arith.addf %1, %132 : vector<24x32xf32>
    %134 = vector.extract_strided_slice %2 {offsets = [5, 0], sizes = [1, 32], strides = [1, 1]} : vector<9x32xf32> to vector<1x32xf32>
    %c0_55 = arith.constant 0 : index
    %c0_56 = arith.constant 0 : index
    %135 = vector.load %arg12[%c0_55, %c0_56] : memref<32x32xf32, #tpu.memory_space<vmem>>, vector<32x32xf32>
    %cst_57 = arith.constant dense<0.000000e+00> : vector<24x32xf32>
    %136 = tpu.matmul %1, %135, %cst_57 {dimension_numbers = #tpu.dot_dimension_numbers<[1], [0], [0], [1], [0, 0, 1, 1], [], []>} : vector<24x32xf32>, vector<32x32xf32>, vector<24x32xf32> -> vector<24x32xf32>
    %137 = vector.broadcast %134 : vector<1x32xf32> to vector<24x32xf32>
    %138 = arith.addf %136, %137 : vector<24x32xf32>
    %cst_58 = arith.constant 5.000000e-01 : f32
    %139 = vector.broadcast %cst_58 : f32 to vector<24x32xf32>
    %140 = arith.mulf %139, %138 : vector<24x32xf32>
    %cst_59 = arith.constant 4.471500e-02 : f32
    %141 = vector.broadcast %cst_59 : f32 to vector<24x32xf32>
    %142 = arith.mulf %141, %138 : vector<24x32xf32>
    %143 = arith.mulf %142, %138 : vector<24x32xf32>
    %144 = arith.mulf %143, %138 : vector<24x32xf32>
    %145 = arith.addf %138, %144 : vector<24x32xf32>
    %cst_60 = arith.constant 0.797884583 : f32
    %146 = vector.broadcast %cst_60 : f32 to vector<24x32xf32>
    %147 = arith.mulf %146, %145 : vector<24x32xf32>
    %148 = math.tanh %147 : vector<24x32xf32>
    %cst_61 = arith.constant 1.000000e+00 : f32
    %149 = vector.broadcast %cst_61 : f32 to vector<24x32xf32>
    %150 = arith.addf %149, %148 : vector<24x32xf32>
    %151 = arith.mulf %140, %150 : vector<24x32xf32>
    %c0_62 = arith.constant 0 : index
    %c0_63 = arith.constant 0 : index
    %152 = vector.load %arg14[%c0_62, %c0_63] : memref<1x32xf32, #tpu.memory_space<vmem>>, vector<1x32xf32>
    %c0_64 = arith.constant 0 : index
    %c0_65 = arith.constant 0 : index
    %153 = vector.load %arg13[%c0_64, %c0_65] : memref<32x32xf32, #tpu.memory_space<vmem>>, vector<32x32xf32>
    %cst_66 = arith.constant dense<0.000000e+00> : vector<24x32xf32>
    %154 = tpu.matmul %151, %153, %cst_66 {dimension_numbers = #tpu.dot_dimension_numbers<[1], [0], [0], [1], [0, 0, 1, 1], [], []>} : vector<24x32xf32>, vector<32x32xf32>, vector<24x32xf32> -> vector<24x32xf32>
    %155 = vector.broadcast %152 : vector<1x32xf32> to vector<24x32xf32>
    %156 = arith.addf %154, %155 : vector<24x32xf32>
    %cst_67 = arith.constant 5.000000e-01 : f32
    %157 = vector.broadcast %cst_67 : f32 to vector<24x32xf32>
    %158 = arith.mulf %157, %156 : vector<24x32xf32>
    %159 = math.tanh %158 : vector<24x32xf32>
    %cst_68 = arith.constant 1.000000e+00 : f32
    %160 = vector.broadcast %cst_68 : f32 to vector<24x32xf32>
    %161 = arith.addf %160, %159 : vector<24x32xf32>
    %cst_69 = arith.constant 5.000000e-01 : f32
    %162 = vector.broadcast %cst_69 : f32 to vector<24x32xf32>
    %163 = arith.mulf %162, %161 : vector<24x32xf32>
    %164 = vector.shape_cast %163 : vector<24x32xf32> to vector<3x8x32xf32>
    %cst_70 = arith.constant dense<0.000000e+00> : vector<8x32xf32>
    %165 = vector.multi_reduction <add>, %164, %cst_70 [0] : vector<3x8x32xf32> to vector<8x32xf32>
    %166 = vector.extract_strided_slice %2 {offsets = [6, 0], sizes = [1, 32], strides = [1, 1]} : vector<9x32xf32> to vector<1x32xf32>
    %c0_71 = arith.constant 0 : index
    %c0_72 = arith.constant 0 : index
    %167 = vector.load %arg15[%c0_71, %c0_72] : memref<32x32xf32, #tpu.memory_space<vmem>>, vector<32x32xf32>
    %cst_73 = arith.constant dense<0.000000e+00> : vector<8x32xf32>
    %168 = tpu.matmul %165, %167, %cst_73 {dimension_numbers = #tpu.dot_dimension_numbers<[1], [0], [0], [1], [0, 0, 1, 1], [], []>} : vector<8x32xf32>, vector<32x32xf32>, vector<8x32xf32> -> vector<8x32xf32>
    %169 = vector.broadcast %166 : vector<1x32xf32> to vector<8x32xf32>
    %170 = arith.addf %168, %169 : vector<8x32xf32>
    %c0_74 = arith.constant 0 : index
    %c0_75 = arith.constant 0 : index
    %171 = vector.load %arg16[%c0_74, %c0_75] : memref<32x32xf32, #tpu.memory_space<vmem>>, vector<32x32xf32>
    %cst_76 = arith.constant dense<0.000000e+00> : vector<24x32xf32>
    %172 = tpu.matmul %133, %171, %cst_76 {dimension_numbers = #tpu.dot_dimension_numbers<[1], [0], [0], [1], [0, 0, 1, 1], [], []>} : vector<24x32xf32>, vector<32x32xf32>, vector<24x32xf32> -> vector<24x32xf32>
    %173 = vector.shape_cast %172 : vector<24x32xf32> to vector<3x8x32xf32>
    %174 = vector.shape_cast %170 : vector<8x32xf32> to vector<1x8x32xf32>
    %175 = vector.broadcast %174 : vector<1x8x32xf32> to vector<3x8x32xf32>
    %176 = arith.addf %173, %175 : vector<3x8x32xf32>
    %177 = vector.extract_strided_slice %2 {offsets = [7, 0], sizes = [1, 32], strides = [1, 1]} : vector<9x32xf32> to vector<1x32xf32>
    %178 = vector.extract_strided_slice %2 {offsets = [8, 0], sizes = [1, 32], strides = [1, 1]} : vector<9x32xf32> to vector<1x32xf32>
    %cst_77 = arith.constant dense<0.000000e+00> : vector<3x8xf32>
    %179 = vector.multi_reduction <add>, %176, %cst_77 [2] : vector<3x8x32xf32> to vector<3x8xf32>
    %180 = vector.shape_cast %179 : vector<3x8xf32> to vector<3x8x1xf32>
    %cst_78 = arith.constant 3.200000e+01 : f32
    %181 = vector.broadcast %cst_78 : f32 to vector<3x8x1xf32>
    %182 = arith.divf %180, %181 : vector<3x8x1xf32>
    %183 = arith.mulf %176, %176 : vector<3x8x32xf32>
    %cst_79 = arith.constant dense<0.000000e+00> : vector<3x8xf32>
    %184 = vector.multi_reduction <add>, %183, %cst_79 [2] : vector<3x8x32xf32> to vector<3x8xf32>
    %185 = vector.shape_cast %184 : vector<3x8xf32> to vector<3x8x1xf32>
    %cst_80 = arith.constant 3.200000e+01 : f32
    %186 = vector.broadcast %cst_80 : f32 to vector<3x8x1xf32>
    %187 = arith.divf %185, %186 : vector<3x8x1xf32>
    %188 = arith.mulf %182, %182 : vector<3x8x1xf32>
    %189 = arith.subf %187, %188 : vector<3x8x1xf32>
    %cst_81 = arith.constant 0.000000e+00 : f32
    %190 = vector.broadcast %cst_81 : f32 to vector<3x8x1xf32>
    %191 = arith.maximumf %189, %190 : vector<3x8x1xf32>
    %192 = vector.broadcast %182 : vector<3x8x1xf32> to vector<3x8x32xf32>
    %193 = arith.subf %176, %192 : vector<3x8x32xf32>
    %cst_82 = arith.constant 9.99999974E-6 : f32
    %194 = vector.broadcast %cst_82 : f32 to vector<3x8x1xf32>
    %195 = arith.addf %191, %194 : vector<3x8x1xf32>
    %196 = math.rsqrt %195 : vector<3x8x1xf32>
    %197 = vector.broadcast %196 : vector<3x8x1xf32> to vector<3x8x32xf32>
    %198 = arith.mulf %193, %197 : vector<3x8x32xf32>
    %199 = vector.shape_cast %177 : vector<1x32xf32> to vector<1x1x32xf32>
    %200 = vector.broadcast %199 : vector<1x1x32xf32> to vector<3x8x32xf32>
    %201 = arith.mulf %198, %200 : vector<3x8x32xf32>
    %202 = vector.shape_cast %178 : vector<1x32xf32> to vector<1x1x32xf32>
    %203 = vector.broadcast %202 : vector<1x1x32xf32> to vector<3x8x32xf32>
    %204 = arith.addf %201, %203 : vector<3x8x32xf32>
    %c0_83 = arith.constant 0 : index
    %c0_84 = arith.constant 0 : index
    %c0_85 = arith.constant 0 : index
    %205 = vector.load %arg18[%c0_83, %c0_84, %c0_85] : memref<3x8x32xf32, #tpu.memory_space<vmem>>, vector<3x8x32xf32>
    tpu.vector_store %arg18[%c0_83, %c0_84, %c0_85], %204 {strides = array<i32>} : memref<3x8x32xf32, #tpu.memory_space<vmem>>, vector<3x8x32xf32>,
    return
  }
  func.func @transform_0(%arg0: i32) -> (i32, i32, i32) {
    %c0_i32 = arith.constant 0 : i32
    %c0_i32_0 = arith.constant 0 : i32
    %c0_i32_1 = arith.constant 0 : i32
    return %c0_i32, %arg0, %c0_i32_0 : i32, i32, i32
  }
  func.func @transform_1(%arg0: i32) -> (i32, i32) {
    %c0_i32 = arith.constant 0 : i32
    %c0_i32_0 = arith.constant 0 : i32
    %c0_i32_1 = arith.constant 0 : i32
    return %c0_i32, %c0_i32_0 : i32, i32
  }
  func.func @transform_2(%arg0: i32) -> (i32, i32) {
    %c0_i32 = arith.constant 0 : i32
    %c0_i32_0 = arith.constant 0 : i32
    %c0_i32_1 = arith.constant 0 : i32
    return %c0_i32, %c0_i32_0 : i32, i32
  }
  func.func @transform_3(%arg0: i32) -> (i32, i32) {
    %c0_i32 = arith.constant 0 : i32
    %c0_i32_0 = arith.constant 0 : i32
    %c0_i32_1 = arith.constant 0 : i32
    return %c0_i32, %c0_i32_0 : i32, i32
  }
  func.func @transform_4(%arg0: i32) -> (i32, i32) {
    %c0_i32 = arith.constant 0 : i32
    %c0_i32_0 = arith.constant 0 : i32
    %c0_i32_1 = arith.constant 0 : i32
    return %c0_i32, %c0_i32_0 : i32, i32
  }
  func.func @transform_5(%arg0: i32) -> (i32, i32) {
    %c0_i32 = arith.constant 0 : i32
    %c0_i32_0 = arith.constant 0 : i32
    %c0_i32_1 = arith.constant 0 : i32
    return %c0_i32, %c0_i32_0 : i32, i32
  }
  func.func @transform_6(%arg0: i32) -> (i32, i32) {
    %c0_i32 = arith.constant 0 : i32
    %c0_i32_0 = arith.constant 0 : i32
    %c0_i32_1 = arith.constant 0 : i32
    return %c0_i32, %c0_i32_0 : i32, i32
  }
  func.func @transform_7(%arg0: i32) -> (i32, i32) {
    %c0_i32 = arith.constant 0 : i32
    %c0_i32_0 = arith.constant 0 : i32
    %c0_i32_1 = arith.constant 0 : i32
    return %c0_i32, %c0_i32_0 : i32, i32
  }
  func.func @transform_8(%arg0: i32) -> (i32, i32) {
    %c0_i32 = arith.constant 0 : i32
    %c0_i32_0 = arith.constant 0 : i32
    %c0_i32_1 = arith.constant 0 : i32
    return %c0_i32, %c0_i32_0 : i32, i32
  }
  func.func @transform_9(%arg0: i32) -> (i32, i32) {
    %c0_i32 = arith.constant 0 : i32
    %c0_i32_0 = arith.constant 0 : i32
    %c0_i32_1 = arith.constant 0 : i32
    return %c0_i32, %c0_i32_0 : i32, i32
  }
  func.func @transform_10(%arg0: i32) -> (i32, i32) {
    %c0_i32 = arith.constant 0 : i32
    %c0_i32_0 = arith.constant 0 : i32
    %c0_i32_1 = arith.constant 0 : i32
    return %c0_i32, %c0_i32_0 : i32, i32
  }
  func.func @transform_11(%arg0: i32) -> (i32, i32) {
    %c0_i32 = arith.constant 0 : i32
    %c0_i32_0 = arith.constant 0 : i32
    %c0_i32_1 = arith.constant 0 : i32
    return %c0_i32, %c0_i32_0 : i32, i32
  }
  func.func @transform_12(%arg0: i32) -> (i32, i32) {
    %c0_i32 = arith.constant 0 : i32
    %c0_i32_0 = arith.constant 0 : i32
    %c0_i32_1 = arith.constant 0 : i32
    return %c0_i32, %c0_i32_0 : i32, i32
  }
  func.func @transform_13(%arg0: i32) -> (i32, i32) {
    %c0_i32 = arith.constant 0 : i32
    %c0_i32_0 = arith.constant 0 : i32
    %c0_i32_1 = arith.constant 0 : i32
    return %c0_i32, %c0_i32_0 : i32, i32
  }
  func.func @transform_14(%arg0: i32) -> (i32, i32) {
    %c0_i32 = arith.constant 0 : i32
    %c0_i32_0 = arith.constant 0 : i32
    %c0_i32_1 = arith.constant 0 : i32
    return %c0_i32, %c0_i32_0 : i32, i32
  }
  func.func @transform_15(%arg0: i32) -> (i32, i32) {
    %c0_i32 = arith.constant 0 : i32
    %c0_i32_0 = arith.constant 0 : i32
    %c0_i32_1 = arith.constant 0 : i32
    return %c0_i32, %c0_i32_0 : i32, i32
  }
  func.func @transform_16(%arg0: i32) -> (i32, i32) {
    %c0_i32 = arith.constant 0 : i32
    %c0_i32_0 = arith.constant 0 : i32
    %c0_i32_1 = arith.constant 0 : i32
    return %c0_i32, %c0_i32_0 : i32, i32
  }
  func.func @transform_17(%arg0: i32) -> (i32, i32, i32) {
    %c0_i32 = arith.constant 0 : i32
    %c0_i32_0 = arith.constant 0 : i32
    %c0_i32_1 = arith.constant 0 : i32
    return %c0_i32, %arg0, %c0_i32_0 : i32, i32, i32
  }
}

</mosaic_0001>

<bundles_post_ra>
// kernel: tpu_custom_call.1
= control target key start
LH: loop header
LB: loop body
LE: loop exit
PB: predicated region body
PF: predicated region fallthrough
CT: control target
= control target key end

     0   :  { %s3168_s0 = inlined_call_operand.hbm [shape: f32[3,8,32], index: 0, kind: input, shape index: {}]   ;;  %s3169_s1 = inlined_call_operand.vmem [shape: f32[32,32], index: 1, kind: input, shape index: {}]   ;;  %s3170_s2 = inlined_call_operand.vmem [shape: f32[32,32], index: 2, kind: input, shape index: {}]   ;;  %s3171_s3 = inlined_call_operand.vmem [shape: f32[32,32], index: 3, kind: input, shape index: {}]   ;;  %s3172_s4 = inlined_call_operand.vmem [shape: f32[32,4], index: 4, kind: input, shape index: {}]   ;;  %s3173_s5 = inlined_call_operand.vmem [shape: f32[4,32], index: 5, kind: input, shape index: {}]   ;;  %s3174_s6 = inlined_call_operand.vmem [shape: f32[32,32], index: 6, kind: input, shape index: {}]   ;;  %s3175_s7 = inlined_call_operand.vmem [shape: f32[32,128], index: 7, kind: input, shape index: {}]   ;;  %s3176_s8 = inlined_call_operand.hbm [shape: f32[1,128], index: 8, kind: input, shape index: {}]   ;;  %s3177_s9 = inlined_call_operand.vmem [shape: f32[128,32], index: 9, kind: input, shape index: {}]   ;;  %s3178_s10 = inlined_call_operand.hbm [shape: f32[32,64], index: 10, kind: input, shape index: {}]   ;;  %s3179_s11 = inlined_call_operand.hbm [shape: f32[32,32], index: 11, kind: input, shape index: {}]   ;;  %s3180_s12 = inlined_call_operand.hbm [shape: f32[32,32], index: 12, kind: input, shape index: {}]   ;;  %s3181_s13 = inlined_call_operand.vmem [shape: f32[1,32], index: 13, kind: input, shape index: {}]   ;;  %s3182_s14 = inlined_call_operand.hbm [shape: f32[32,32], index: 14, kind: input, shape index: {}]   ;;  %s3183_s15 = inlined_call_operand.hbm [shape: f32[32,32], index: 15, kind: input, shape index: {}]   ;;  %s3184_s16 = inlined_call_operand.vmem [shape: f32[9,32], index: 16, kind: input, shape index: {}]   ;;  %s3185_s17 = inlined_call_operand.hbm [shape: f32[3,8,32], index: 17, kind: output, shape index: {}]  }
   0x1   :  { %3187 = sst [smem:[#allocation20_spill]] %s3168_s0 }
   0x2   :  { %3188 = sst [smem:[#allocation21_spill]] %s3169_s1 }
   0x3   :  { %22 = vsyncpa [#allocation3], 0 }
   0x4   :  { %23 = vsyncpa [#allocation6], 0 }
   0x5   :  { %24 = vsyncpa [#allocation9], 0 }
   0x6   :  { %25 = vsyncpa [#allocation12], 0 }
   0x7   :  { %26 = vsyncpa [#allocation4], 0  ;;  %s2541_s24 = smov [#allocation5]  }
   0x8   :  { %s59_s25 = sshll.u32 %s2541_s24, 4  ;;  %s60_s25 = int_to_ptr.vmem [resolvable:$true] %s59_s25 }
   0x9   :  { %s2379_s26 = scalar_lea.vmem %s60_s25, 16  ;;  %s2383_s27 = scalar_lea.vmem %s60_s25, 32 }
   0xa   :  { %p2380_p0 = scmp.ne.s32.totalorder %s60_s25, %s2379_s26  ;;  %p2384_p1 = scmp.lt.s32.totalorder %s60_s25, %s60_s25 }
   0xb   :  { %p2385_p2 = scmp.lt.s32.totalorder %s2383_s27, %s2379_s26 }
   0xd   :  { %p2386_p3 = por %p2385_p2, %p2384_p1 }
   0xf   :  { %p2387_p4 = pnand %p2386_p3, %p2380_p0 }
  0x11   :  { %2390 = shalt.err (!%p2387_p4)
}
  0x12   :  { %62 = dma.hbm_to_vmem [thread:$0]  %s3176_s8, 16, %s60_s25, [#allocation6]  }
  0x13   :  { %s2542_s0 = smov [#allocation8]   ;;  %s2543_s18 = smov [#allocation11]  }
  0x14   :  { %s82_s30 = sshll.u32 %s2542_s0, 4  ;;  %s108_s19 = sshll.u32 %s2543_s18, 4  ;;  %s83_s30 = int_to_ptr.vmem [resolvable:$true] %s82_s30  ;;  %s109_s19 = int_to_ptr.vmem [resolvable:$true] %s108_s19 }
  0x15   :  { %s2399_s1 = scalar_lea.vmem %s83_s30, 512  ;;  %p2404_p6 = scmp.lt.s32.totalorder %s83_s30, %s83_s30 }
  0x16   :  { %p2400_p5 = scmp.ne.s32.totalorder %s83_s30, %s2399_s1  ;;  %p2405_p7 = scmp.lt.s32.totalorder %s2399_s1, %s2399_s1 }
  0x18   :  { %p2406_p8 = por %p2405_p7, %p2404_p6 }
  0x1a   :  { %p2407_p9 = pnand %p2406_p8, %p2400_p5 }
  0x1c   :  { %2410 = shalt.err (!%p2407_p9)
}
  0x1d   :  { %s2544_s20 = smov 128   ;;  %s2545_s21 = smov 8  }
  0x1e   :  { %88 = dma.hbm_to_vmem [thread:$0]  %s3179_s11, 512, %s83_s30, [#allocation9], %s2544_s20, %s2544_s20, %s2545_s21  }
  0x1f   :  { %s2419_s8 = scalar_lea.vmem %s109_s19, 512  ;;  %p2424_p11 = scmp.lt.s32.totalorder %s109_s19, %s109_s19 }
  0x20   :  { %p2420_p10 = scmp.ne.s32.totalorder %s109_s19, %s2419_s8  ;;  %p2425_p12 = scmp.lt.s32.totalorder %s2419_s8, %s2419_s8 }
  0x22   :  { %p2426_p13 = por %p2425_p12, %p2424_p11 }
  0x24   :  { %p2427_p0 = pnand %p2426_p13, %p2420_p10 }
  0x26   :  { %2430 = shalt.err (!%p2427_p0)
}
  0x27   :  { %114 = dma.hbm_to_vmem [thread:$0]  %s3182_s14, 512, %s109_s19, [#allocation12], %s2544_s20, %s2544_s20, %s2545_s21  }
  0x28   :  { %s2546_s26 = smov [#allocation2]   ;;  %s2547_s28 = smov [#allocation7]  }
  0x29   :  { %s32_s27 = sshll.u32 %s2546_s26, 4  ;;  %s70_s11 = sshll.u32 %s2547_s28, 4  ;;  %s33_s27 = int_to_ptr.vmem [resolvable:$true] %s32_s27  ;;  %s71_s11 = int_to_ptr.vmem [resolvable:$true] %s70_s11 }
  0x2a   :  { %s2439_s29 = scalar_lea.vmem %s33_s27, 384  ;;  %p2444_p2 = scmp.lt.s32.totalorder %s33_s27, %s33_s27 }
  0x2b   :  { %p2440_p1 = scmp.ne.s32.totalorder %s33_s27, %s2439_s29  ;;  %p2445_p3 = scmp.lt.s32.totalorder %s2439_s29, %s2439_s29 }
  0x2d   :  { %p2446_p4 = por %p2445_p3, %p2444_p2 }
  0x2f   :  { %p2447_p5 = pnand %p2446_p4, %p2440_p1 }
  0x31   :  { %2450 = shalt.err (!%p2447_p5)
}
  0x32   :  { %s3189_s18 = sld [smem:[#allocation20_spill]]  ;;  %s2459_s14 = scalar_lea.vmem %s71_s11, 512 }
  0x33   :  { %p2460_p6 = scmp.ne.s32.totalorder %s71_s11, %s2459_s14  ;;  %p2464_p7 = scmp.lt.s32.totalorder %s71_s11, %s71_s11 }
  0x34   :  { %p2465_p8 = scmp.lt.s32.totalorder %s2459_s14, %s2459_s14 }
  0x36   :  { %p2466_p9 = por %p2465_p8, %p2464_p7 }
  0x38   :  { %38 = dma.hbm_to_vmem [thread:$0]  %s3189_s18, 384, %s33_s27, [#allocation3], %s2544_s20, %s2544_s20, %s2545_s21  }
  0x39   :  { %p2467_p10 = pnand %p2466_p9, %p2460_p6 }
  0x3b   :  { %2470 = shalt.err (!%p2467_p10)
}
  0x3c   :  { %76 = dma.hbm_to_vmem [thread:$0]  %s3178_s10, 512, %s71_s11, [#allocation6], %s2544_s20, %s2544_s20, %s2545_s21  }
  0x3d   :  { %s2548_s22 = smov [#allocation10]   ;;  %s2549_s8 = smov [#allocation13]  }
  0x3e   :  { %s94_s23 = sshll.u32 %s2548_s22, 4  ;;  %s120_s24 = sshll.u32 %s2549_s8, 4  ;;  %s95_s23 = int_to_ptr.vmem [resolvable:$true] %s94_s23  ;;  %s121_s24 = int_to_ptr.vmem [resolvable:$true] %s120_s24 }
  0x3f   :  { %s2479_s25 = scalar_lea.vmem %s95_s23, 512  ;;  %p2484_p12 = scmp.lt.s32.totalorder %s95_s23, %s95_s23 }
  0x40   :  { %p2480_p11 = scmp.ne.s32.totalorder %s95_s23, %s2479_s25  ;;  %p2485_p13 = scmp.lt.s32.totalorder %s2479_s25, %s2479_s25 }
  0x42   :  { %p2486_p0 = por %p2485_p13, %p2484_p12 }
  0x44   :  { %p2487_p1 = pnand %p2486_p0, %p2480_p11 }
  0x46   :  { %2490 = shalt.err (!%p2487_p1)
}
  0x47   :  { %100 = dma.hbm_to_vmem [thread:$0]  %s3180_s12, 512, %s95_s23, [#allocation9], %s2544_s20, %s2544_s20, %s2545_s21  }
  0x48   :  { %s2499_s10 = scalar_lea.vmem %s121_s24, 512  ;;  %p2504_p3 = scmp.lt.s32.totalorder %s121_s24, %s121_s24 }
  0x49   :  { %p2500_p2 = scmp.ne.s32.totalorder %s121_s24, %s2499_s10  ;;  %p2505_p4 = scmp.lt.s32.totalorder %s2499_s10, %s2499_s10 }
  0x4b   :  { %p2506_p5 = por %p2505_p4, %p2504_p3 }
  0x4d   :  { %p2507_p6 = pnand %p2506_p5, %p2500_p2 }
  0x4f   :  { %2510 = shalt.err (!%p2507_p6)
}
  0x50   :  { %126 = dma.hbm_to_vmem [thread:$0]  %s3183_s15, 512, %s121_s24, [#allocation12], %s2544_s20, %s2544_s20, %s2545_s21  }
  0x51   :  { %2531 = dma.done.wait [#allocation3], 384  }
  0x52   :  { %2532 = vsyncadd [#allocation3], 4294966912 }
  0x53   :  { %2533 = dma.done.wait [#allocation6], 528  }
  0x54   :  { %2534 = vsyncadd [#allocation6], 4294966768 }
  0x55   :  { %2535 = dma.done.wait [#allocation9], 1024  }
  0x56   :  { %2536 = vsyncadd [#allocation9], 4294966272 }
  0x57   :  { %2537 = dma.done.wait [#allocation12], 1024  }
  0x58   :  { %2538 = vsyncadd [#allocation12], 4294966272  ;;  %vm155_vm0 = vcmask 261120   ;;  %v2682_v0 = vld [vmem:[#allocation2 + $0x8] sm:$0xff]  ;;  %v2684_v1 = vld [vmem:[#allocation2] sm:$0xff]  ;;  %s3190_s29 = sld [smem:[#allocation21_spill]]  ;;  %v209_v62 = vlaneseq }
  0x59   :  { %v2686_v2 = vld [vmem:[#allocation2 + $0x10] sm:$0xff]  ;;  %v159_v3 = vsel %vm155_vm0, %v2682_v0, 0.0  ;;  %v156_v4 = vsel %vm155_vm0, %v2684_v1, 0.0  ;;  %v170_v5 = vmul.f32 %v2682_v0, %v2682_v0  ;;  %v169_v6 = vmul.f32 %v2684_v1, %v2684_v1  ;;  %v305_v13 = vld [vmem:[%s3170_s2 + $0x18] sm:$0xff]  ;;  %v303_v18 = vld [vmem:[%s3170_s2 + $0x8] sm:$0xff] }
  0x5a   :  { %160 = vadd.xlane.f32.xlu1 %v159_v3  ;;  %157 = vadd.xlane.f32.xlu0 %v156_v4  ;;  %v171_v9 = vmul.f32 %v2686_v2, %v2686_v2  ;;  %v162_v10 = vsel %vm155_vm0, %v2686_v2, 0.0  ;;  %v2550_v14 = vmov 0.0   ;;  %v304_v16 = vld [vmem:[%s3170_s2 + $0x10] sm:$0xff]  ;;  %v302_v20 = vld [vmem:[%s3170_s2] sm:$0xff]  ;;  %vm2551_vm1 = vmmov 0   ;;  %v393_v49 = vld [vmem:[%s3171_s3 + $0x18] sm:$0xff] }
  0x5b   :  { %v175_v7 = vsel %vm155_vm0, %v170_v5, 0.0  ;;  %v172_v8 = vsel %vm155_vm0, %v169_v6, 0.0  ;;  %2020 = vmatprep.subr.mxu0 %v2550_v14  ;;  %2037 = vmatprep.subr.mxu1 %v2550_v14  ;;  %v490_v50 = vld [vmem:[%s3172_s4 + $0x18] sm:$0xff]  ;;  %v392_v54 = vld [vmem:[%s3171_s3 + $0x10] sm:$0xff]  ;;  %v391_v58 = vld [vmem:[%s3171_s3 + $0x8] sm:$0xff]  ;;  %v2803_v63 = vshrl.u32 %v209_v62, 7 }
  0x5c   :  { %v178_v11 = vsel %vm155_vm0, %v171_v9, 0.0  ;;  %2038 = vmatpush3.msra.mxu1 %v305_v13  ;;  %2028 = vmatprep.mubr.msk.f32.mxu0 %vm2551_vm1, %v2550_v14  ;;  %v489_v55 = vld [vmem:[%s3172_s4 + $0x10] sm:$0xff]  ;;  %v488_v59 = vld [vmem:[%s3172_s4 + $0x8] sm:$0xff]  ;;  %v390_v60 = vld [vmem:[%s3171_s3] sm:$0xff]  ;;  %vm726_vm2 = vcmask 1043456   ;;  %vm628_vm3 = vcmask 31744  }
  0x5d   :  { %2039 = vmatprep.subr.mxu1 %v2550_v14  ;;  %2045 = vmatprep.mubr.msk.f32.mxu1 %vm2551_vm1, %v2550_v14  ;;  %v487_v61 = vld [vmem:[%s3172_s4] sm:$0xff]  ;;  %v211_v3 = vsub.s32 0, %v2803_v63  ;;  %v308_v4 = vsub.s32 1, %v2803_v63  ;;  %vm1335_vm4 = vcmask 523264  }
  0x5e   :  { %176 = vadd.xlane.f32.xlu1 %v175_v7  ;;  %173 = vadd.xlane.f32.xlu0 %v172_v8  ;;  %v208_v12 = vld [vmem:[%s3190_s29 + $0x18] sm:$0xff]  ;;  %v207_v15 = vld [vmem:[%s3190_s29 + $0x10] sm:$0xff]  ;;  %v206_v17 = vld [vmem:[%s3190_s29 + $0x8] sm:$0xff] }
  0x5f   :  { %2021 = vmatpush3.msra.mxu0 %v208_v12  ;;  %2040 = vmatpush3.msra.mxu1 %v304_v16  ;;  %v205_v19 = vld [vmem:[%s3190_s29] sm:$0xff] }
  0x60   :  { %2022 = vmatprep.subr.mxu0 %v2550_v14  ;;  %2041 = vmatprep.subr.mxu1 %v2550_v14  ;;  %v2810_v5 = vld [vmem:[%s3184_s16] sm:$0xff] }
  0x61   :  { %2023 = vmatpush3.msra.mxu0 %v207_v15  ;;  %2042 = vmatpush3.msra.mxu1 %v303_v18  ;;  %v212_v6 = vrot.slane %v2810_v5, %v211_v3  ;;  %v309_v7 = vrot.slane %v2810_v5, %v308_v4 }
  0x62   :  { %163 = vadd.xlane.f32.xlu0 %v162_v10  ;;  %179 = vadd.xlane.f32.xlu1 %v178_v11 }
  0x63   :  { %2024 = vmatprep.subr.mxu0 %v2550_v14  ;;  %2043 = vmatprep.subr.mxu1 %v2550_v14 }
  0x64   :  { %2025 = vmatpush3.msra.mxu0 %v206_v17  ;;  %2044 = vmatpush3.msra.mxu1 %v302_v20 }
  0x65   :  { %2026 = vmatprep.subr.mxu0 %v2550_v14  ;;  %2071 = vmatprep.subr.mxu1 %v2550_v14 }
  0x66   :  { %2027 = vmatpush3.msra.mxu0 %v205_v19 }
  0x67   :  { %2054 = vmatprep.subr.mxu0 %v2550_v14 }
  0xe3   :  { %v161_v21 = vpop.xlane.xlu1 %160  ;;  %v158_v22 = vpop.xlane.xlu0 %157 }
  0xe4   :  { %v167_v23 = vmul.f32 0.03125, %v161_v21  ;;  %v166_v24 = vmul.f32 0.03125, %v158_v22 }
  0xe6   :  { %v185_v25 = vmul.f32 %v167_v23, %v167_v23  ;;  %v184_v28 = vmul.f32 %v166_v24, %v166_v24  ;;  %v193_v45 = vsub.f32 %v2684_v1, %v166_v24  ;;  %v194_v51 = vsub.f32 %v2682_v0, %v167_v23 }
  0xe7   :  { %v177_v26 = vpop.xlane.xlu1 %176  ;;  %v174_v27 = vpop.xlane.xlu0 %173 }
  0xe8   :  { %v182_v29 = vmul.f32 0.03125, %v177_v26  ;;  %v181_v30 = vmul.f32 0.03125, %v174_v27 }
  0xea   :  { %v188_v31 = vsub.f32 %v182_v29, %v185_v25  ;;  %v187_v32 = vsub.f32 %v181_v30, %v184_v28 }
  0xeb   :  { %v164_v33 = vpop.xlane.xlu0 %163  ;;  %v180_v34 = vpop.xlane.xlu1 %179 }
  0xec   :  { %v191_v35 = vmax.f32 %v188_v31, 0.0  ;;  %v190_v36 = vmax.f32 %v187_v32, 0.0  ;;  %v168_v37 = vmul.f32 0.03125, %v164_v33  ;;  %v183_v38 = vmul.f32 0.03125, %v180_v34 }
  0xee   :  { %v196_v39 = vadd.f32 1e-05, %v190_v36  ;;  %v186_v40 = vmul.f32 %v168_v37, %v168_v37  ;;  %v197_v41 = vadd.f32 1e-05, %v191_v35  ;;  %v195_v56 = vsub.f32 %v2686_v2, %v168_v37 }
  0xf0   :  { %v189_v42 = vsub.f32 %v183_v38, %v186_v40  ;;  %2301 = vrsqrt.f32 %v196_v39 }
  0xf1   :  { %2303 = vrsqrt.f32 %v197_v41 }
  0xf2   :  { %v192_v43 = vmax.f32 %v189_v42, 0.0  ;;  %v698_v42 = vld [vmem:[%s3173_s5] sm:$0xf]  ;;  %s2552_s5 = smov [#allocation14]  }
  0xf3   :  { %s1845_s2 = sshll.u32 %s2552_s5, 4  ;;  %s1846_s2 = int_to_ptr.vmem [resolvable:$true] %s1845_s2 }
  0xf4   :  { %v198_v44 = vadd.f32 1e-05, %v192_v43  ;;  %v867_v43 = vld [vmem:[%s3174_s6 + $0x18] sm:$0xff]  ;;  %p2516_p8 = scmp.lt.s32.totalorder %s1846_s2, %s1846_s2 }
  0xf6   :  { %2305 = vrsqrt.f32 %v198_v44 }
  0xfd   :  { %v2302_v46 = vpop.eup %2301 }
  0xfe   :  { %v202_v47 = vmul.f32 %v2302_v46, %v193_v45  ;;  %v2304_v48 = vpop.eup %2303 }
  0xff   :  { %v203_v52 = vmul.f32 %v2304_v48, %v194_v51 }
 0x100   :  { %2029 = vmatmul.mubr.msk.f32.vlgmr.msra.gmra.mxu0 %vm155_vm0, %v202_v47  ;;  %2046 = vmatmul.mubr.msk.f32.vlgmr.msra.gmra.mxu1 %vm155_vm0, %v202_v47 }
 0x101   :  { %2031 = vmatprep.mubr.msk.f32.mxu0 %vm2551_vm1, %v2550_v14  ;;  %2048 = vmatprep.mubr.msk.f32.mxu1 %vm2551_vm1, %v2550_v14 }
 0x102   :  { %2055 = vmatpush3.msra.mxu0 %v393_v49  ;;  %2072 = vmatpush3.msra.mxu1 %v490_v50 }
 0x103   :  { %v2306_v53 = vpop.eup %2305  ;;  %2056 = vmatprep.subr.mxu0 %v2550_v14  ;;  %2073 = vmatprep.subr.mxu1 %v2550_v14 }
 0x104   :  { %2032 = vmatmul.mubr.msk.f32.gmra.mxu0 %vm155_vm0, %v203_v52  ;;  %2049 = vmatmul.mubr.msk.f32.gmra.mxu1 %vm155_vm0, %v203_v52  ;;  %v204_v57 = vmul.f32 %v2306_v53, %v195_v56 }
 0x105   :  { %2034 = vmatprep.mubr.msk.f32.mxu0 %vm2551_vm1, %v2550_v14  ;;  %2051 = vmatprep.mubr.msk.f32.mxu1 %vm2551_vm1, %v2550_v14 }
 0x106   :  { %2057 = vmatpush3.msra.mxu0 %v392_v54  ;;  %2074 = vmatpush3.msra.mxu1 %v489_v55 }
 0x107   :  { %2058 = vmatprep.subr.mxu0 %v2550_v14  ;;  %2075 = vmatprep.subr.mxu1 %v2550_v14 }
 0x108   :  { %2035 = vmatmul.mubr.msk.f32.gmra.mxu0 %vm155_vm0, %v204_v57  ;;  %2052 = vmatmul.mubr.msk.f32.gmra.mxu1 %vm155_vm0, %v204_v57 }
 0x109   :  { %2059 = vmatpush3.msra.mxu0 %v391_v58  ;;  %2062 = vmatprep.mubr.msk.f32.mxu0 %vm2551_vm1, %v2550_v14 }
 0x10a   :  { %2060 = vmatprep.subr.mxu0 %v2550_v14  ;;  %2076 = vmatpush3.msra.mxu1 %v488_v59 }
 0x10b   :  { %2061 = vmatpush3.msra.mxu0 %v390_v60  ;;  %2077 = vmatprep.subr.mxu1 %v2550_v14 }
 0x10c   :  { %2063 = vmatmul.mubr.msk.f32.vlgmr.msra.gmra.mxu0 %vm155_vm0, %v202_v47  ;;  %2079 = vmatprep.mubr.msk.f32.mxu1 %vm2551_vm1, %v2550_v14 }
 0x10d   :  { %2065 = vmatprep.mubr.msk.f32.mxu0 %vm2551_vm1, %v2550_v14  ;;  %2106 = vmatprep.subr.mxu0 %v2550_v14 }
 0x10e   :  { %2078 = vmatpush3.msra.mxu1 %v487_v61  ;;  %2107 = vmatpush3.msk.msra.mxu0 %vm726_vm2, %v698_v42 }
 0x10f   :  { %2135 = vmatprep.subr.mxu1 %v2550_v14  ;;  %2152 = vmatprep.subr.mxu0 %v2550_v14 }
 0x110   :  { %2066 = vmatmul.mubr.msk.f32.gmra.mxu0 %vm155_vm0, %v203_v52 }
 0x111   :  { %2068 = vmatprep.mubr.msk.f32.mxu0 %vm2551_vm1, %v2550_v14 }
 0x114   :  { %2069 = vmatmul.mubr.msk.f32.gmra.mxu0 %vm155_vm0, %v204_v57 }
 0x115   :  { %2108 = vmatprep.mubr.msk.f32.mxu0 %vm2551_vm1, %v2550_v14 }
 0x1c0   :  { %v288_v8 = vpop.f32.mrf.mxu0  ;;  %v376_v9 = vpop.f32.mrf.mxu1 }
 0x1c1   :  { %v289_v10 = vadd.f32 %v288_v8, %v212_v6  ;;  %v377_v11 = vadd.f32 %v376_v9, %v309_v7 }
 0x1c2   :  { %v2030_v12 = vpop.f32.mrf.mxu0  ;;  %v2047_v13 = vpop.f32.mrf.mxu1 }
 0x1c3   :  { %v478_v15 = vmul.f32 %v377_v11, %v289_v10 }
 0x1c4   :  { %v293_v16 = vpop.f32.mrf.mxu0  ;;  %v381_v17 = vpop.f32.mrf.mxu1 }
 0x1c5   :  { %v382_v18 = vadd.f32 %v381_v17, %v309_v7  ;;  %2080 = vmatmul.mubr.msk.f32.vlgmr.msra.gmra.mxu1 %vm155_vm0, %v478_v15  ;;  %v294_v27 = vadd.f32 %v293_v16, %v212_v6 }
 0x1c6   :  { %v2033_v19 = vpop.f32.mrf.mxu0  ;;  %v2050_v20 = vpop.f32.mrf.mxu1  ;;  %2082 = vmatprep.mubr.msk.f32.mxu1 %vm2551_vm1, %v2550_v14  ;;  %2136 = vmatpush3.msra.mxu1 %v867_v43 }
 0x1c7   :  { %v479_v21 = vmul.f32 %v382_v18, %v289_v10  ;;  %v481_v31 = vmul.f32 %v377_v11, %v294_v27  ;;  %v482_v34 = vmul.f32 %v382_v18, %v294_v27  ;;  %2137 = vmatprep.subr.mxu1 %v2550_v14 }
 0x1c8   :  { %v298_v22 = vpop.f32.mrf.mxu0  ;;  %v386_v23 = vpop.f32.mrf.mxu1 }
 0x1c9   :  { %v387_v24 = vadd.f32 %v386_v23, %v309_v7  ;;  %2083 = vmatmul.mubr.msk.f32.gmra.mxu1 %vm155_vm0, %v479_v21  ;;  %v299_v37 = vadd.f32 %v298_v22, %v212_v6 }
 0x1ca   :  { %v2036_v25 = vpop.f32.mrf.mxu0  ;;  %v2053_v26 = vpop.f32.mrf.mxu1  ;;  %2085 = vmatprep.mubr.msk.f32.mxu1 %vm2551_vm1, %v2550_v14 }
 0x1cb   :  { %v480_v28 = vmul.f32 %v387_v24, %v289_v10  ;;  %v483_v38 = vmul.f32 %v387_v24, %v294_v27  ;;  %v484_v39 = vmul.f32 %v377_v11, %v299_v37  ;;  %v485_v40 = vmul.f32 %v382_v18, %v299_v37 }
 0x1cc   :  { %v2820_v29 = vpop.f32.mrf.mxu0  ;;  %v486_v41 = vmul.f32 %v387_v24, %v299_v37 }
 0x1cd   :  { %2086 = vmatmul.mubr.msk.f32.gmra.mxu1 %vm155_vm0, %v480_v28 }
 0x1ce   :  { %v2064_v30 = vpop.f32.mrf.mxu0  ;;  %2088 = vmatprep.mubr.msk.f32.mxu1 %vm2551_vm1, %v2550_v14 }
 0x1d0   :  { %v2825_v32 = vpop.f32.mrf.mxu0 }
 0x1d1   :  { %2089 = vmatmul.mubr.msk.f32.gmra.mxu1 %vm155_vm0, %v481_v31 }
 0x1d2   :  { %v2067_v33 = vpop.f32.mrf.mxu0  ;;  %2091 = vmatprep.mubr.msk.f32.mxu1 %vm2551_vm1, %v2550_v14 }
 0x1d4   :  { %v2830_v35 = vpop.f32.mrf.mxu0 }
 0x1d5   :  { %2092 = vmatmul.mubr.msk.f32.gmra.mxu1 %vm155_vm0, %v482_v34 }
 0x1d6   :  { %v2070_v36 = vpop.f32.mrf.mxu0  ;;  %2094 = vmatprep.mubr.msk.f32.mxu1 %vm2551_vm1, %v2550_v14 }
 0x1d9   :  { %2095 = vmatmul.mubr.msk.f32.gmra.mxu1 %vm155_vm0, %v483_v38 }
 0x1da   :  { %2097 = vmatprep.mubr.msk.f32.mxu1 %vm2551_vm1, %v2550_v14 }
 0x1dd   :  { %2098 = vmatmul.mubr.msk.f32.gmra.mxu1 %vm155_vm0, %v484_v39 }
 0x1de   :  { %2100 = vmatprep.mubr.msk.f32.mxu1 %vm2551_vm1, %v2550_v14 }
 0x1e1   :  { %2101 = vmatmul.mubr.msk.f32.gmra.mxu1 %vm155_vm0, %v485_v40 }
 0x1e2   :  { %2103 = vmatprep.mubr.msk.f32.mxu1 %vm2551_vm1, %v2550_v14 }
 0x1e5   :  { %2104 = vmatmul.mubr.msk.f32.gmra.mxu1 %vm155_vm0, %v486_v41 }
 0x1e6   :  { %2143 = vmatprep.mubr.msk.f32.mxu1 %vm2551_vm1, %v2550_v14 }
 0x285   :  { %v584_v44 = vpop.f32.mrf.mxu1 }
 0x286   :  { %v629_v49 = vsel %vm628_vm3, %v584_v44, -inf }
 0x287   :  { %v2081_v45 = vpop.f32.mrf.mxu1 }
 0x289   :  { %v589_v46 = vpop.f32.mrf.mxu1 }
 0x28a   :  { %v630_v53 = vsel %vm628_vm3, %v589_v46, -inf }
 0x28b   :  { %v2084_v47 = vpop.f32.mrf.mxu1 }
 0x28d   :  { %v594_v48 = vpop.f32.mrf.mxu1 }
 0x28e   :  { %v631_v50 = vsel %vm628_vm3, %v594_v48, -inf }
 0x28f   :  { %v632_v51 = vmax.f32 %v629_v49, %v631_v50  ;;  %v2087_v52 = vpop.f32.mrf.mxu1 }
 0x291   :  { %v633_v54 = vmax.f32 %v632_v51, %v630_v53  ;;  %v599_v55 = vpop.f32.mrf.mxu1 }
 0x292   :  { %v634_v7 = vsel %vm628_vm3, %v599_v55, -inf }
 0x293   :  { %v644_v56 = vsub.f32 %v584_v44, %v633_v54  ;;  %v645_v57 = vsub.f32 %v589_v46, %v633_v54  ;;  %v646_v58 = vsub.f32 %v594_v48, %v633_v54  ;;  %v2090_v59 = vpop.f32.mrf.mxu1 }
 0x295   :  { %v653_v60 = vmul.f32 1.442695, %v644_v56  ;;  %v655_v61 = vmul.f32 1.442695, %v645_v57  ;;  %v657_v62 = vmul.f32 1.442695, %v646_v58  ;;  %v604_v3 = vpop.f32.mrf.mxu1 }
 0x296   :  { %v635_v11 = vsel %vm628_vm3, %v604_v3, -inf }
 0x297   :  { %2307 = vpow2.f32 %v653_v60  ;;  %v2093_v4 = vpop.f32.mrf.mxu1 }
 0x298   :  { %2309 = vpow2.f32 %v655_v61 }
 0x299   :  { %2311 = vpow2.f32 %v657_v62  ;;  %v609_v6 = vpop.f32.mrf.mxu1 }
 0x29a   :  { %v636_v8 = vsel %vm628_vm3, %v609_v6, -inf }
 0x29b   :  { %v637_v9 = vmax.f32 %v634_v7, %v636_v8  ;;  %v2096_v10 = vpop.f32.mrf.mxu1 }
 0x29d   :  { %v638_v12 = vmax.f32 %v637_v9, %v635_v11  ;;  %v614_v13 = vpop.f32.mrf.mxu1 }
 0x29e   :  { %v639_v31 = vsel %vm628_vm3, %v614_v13, -inf }
 0x29f   :  { %v647_v15 = vsub.f32 %v599_v55, %v638_v12  ;;  %v648_v16 = vsub.f32 %v604_v3, %v638_v12  ;;  %v649_v17 = vsub.f32 %v609_v6, %v638_v12  ;;  %v2099_v18 = vpop.f32.mrf.mxu1 }
 0x2a0   :  { %v866_v18 = vld [vmem:[%s3174_s6 + $0x10] sm:$0xff] }
 0x2a1   :  { %v659_v19 = vmul.f32 1.442695, %v647_v15  ;;  %v661_v20 = vmul.f32 1.442695, %v648_v16  ;;  %v663_v21 = vmul.f32 1.442695, %v649_v17  ;;  %v619_v22 = vpop.f32.mrf.mxu1  ;;  %2138 = vmatpush3.msra.mxu1 %v866_v18 }
 0x2a2   :  { %v640_v39 = vsel %vm628_vm3, %v619_v22, -inf  ;;  %2139 = vmatprep.subr.mxu1 %v2550_v14 }
 0x2a3   :  { %2313 = vpow2.f32 %v659_v19  ;;  %v2102_v23 = vpop.f32.mrf.mxu1  ;;  %v865_v19 = vld [vmem:[%s3174_s6 + $0x8] sm:$0xff] }
 0x2a4   :  { %v2308_v24 = vpop.eup %2307  ;;  %2315 = vpow2.f32 %v661_v20  ;;  %2140 = vmatpush3.msra.mxu1 %v865_v19  ;;  %v864_v20 = vld [vmem:[%s3174_s6] sm:$0xff] }
 0x2a5   :  { %v2310_v25 = vpop.eup %2309  ;;  %v671_v26 = vsel %vm628_vm3, %v2308_v24, 0.0  ;;  %2317 = vpow2.f32 %v663_v21  ;;  %v624_v27 = vpop.f32.mrf.mxu1  ;;  %2141 = vmatprep.subr.mxu1 %v2550_v14  ;;  %v396_v21 = vsub.s32 2, %v2803_v63 }
 0x2a6   :  { %v2312_v28 = vpop.eup %2311  ;;  %v672_v30 = vsel %vm628_vm3, %v2310_v25, 0.0  ;;  %v641_v33 = vsel %vm628_vm3, %v624_v27, -inf  ;;  %2142 = vmatpush3.msra.mxu1 %v864_v20 }
 0x2a7   :  { %v673_v34 = vadd.f32 %v672_v30, %v671_v26  ;;  %v642_v36 = vmax.f32 %v639_v31, %v641_v33  ;;  %v2105_v37 = vpop.f32.mrf.mxu1  ;;  %v674_v38 = vsel %vm628_vm3, %v2312_v28, 0.0  ;;  %2169 = vmatprep.subr.mxu1 %v2550_v14 }
 0x2a9   :  { %v675_v40 = vadd.f32 %v674_v38, %v673_v34  ;;  %v643_v41 = vmax.f32 %v642_v36, %v640_v39 }
 0x2ab   :  { %2319 = vrcp.f32 %v675_v40  ;;  %v650_v42 = vsub.f32 %v614_v13, %v643_v41  ;;  %v651_v43 = vsub.f32 %v619_v22, %v643_v41  ;;  %v652_v44 = vsub.f32 %v624_v27, %v643_v41 }
 0x2ac   :  { %v397_v22 = vrot.slane %v2810_v5, %v396_v21 }
 0x2ad   :  { %v665_v45 = vmul.f32 1.442695, %v650_v42  ;;  %v667_v46 = vmul.f32 1.442695, %v651_v43  ;;  %v669_v47 = vmul.f32 1.442695, %v652_v44 }
 0x2ae   :  { %v470_v26 = vadd.f32 %v2825_v32, %v397_v22  ;;  %v475_v33 = vadd.f32 %v2830_v35, %v397_v22 }
 0x2af   :  { %2321 = vpow2.f32 %v665_v45 }
 0x2b0   :  { %v2314_v48 = vpop.eup %2313  ;;  %2323 = vpow2.f32 %v667_v46 }
 0x2b1   :  { %v2316_v49 = vpop.eup %2315  ;;  %v676_v50 = vsel %vm628_vm3, %v2314_v48, 0.0  ;;  %2325 = vpow2.f32 %v669_v47 }
 0x2b2   :  { %v2318_v51 = vpop.eup %2317  ;;  %v677_v52 = vsel %vm628_vm3, %v2316_v49, 0.0 }
 0x2b3   :  { %v678_v53 = vadd.f32 %v677_v52, %v676_v50  ;;  %v679_v54 = vsel %vm628_vm3, %v2318_v51, 0.0 }
 0x2b5   :  { %v680_v55 = vadd.f32 %v679_v54, %v678_v53 }
 0x2b7   :  { %2327 = vrcp.f32 %v680_v55 }
 0x2b8   :  { %v2320_v56 = vpop.eup %2319 }
 0x2b9   :  { %v689_v57 = vmul.f32 %v2320_v56, %v2308_v24  ;;  %v690_v61 = vmul.f32 %v2320_v56, %v2310_v25  ;;  %v691_v8 = vmul.f32 %v2320_v56, %v2312_v28  ;;  %v465_v24 = vadd.f32 %v2820_v29, %v397_v22 }
 0x2bb   :  { %2109 = vmatmul.mubr.msk.f32.vlgmr.msra.gmra.mxu0 %vm628_vm3, %v689_v57 }
 0x2bc   :  { %v2322_v58 = vpop.eup %2321  ;;  %2111 = vmatprep.mubr.msk.f32.mxu0 %vm2551_vm1, %v2550_v14 }
 0x2bd   :  { %v2324_v59 = vpop.eup %2323  ;;  %v681_v60 = vsel %vm628_vm3, %v2322_v58, 0.0 }
 0x2be   :  { %v2326_v62 = vpop.eup %2325  ;;  %v682_v3 = vsel %vm628_vm3, %v2324_v59, 0.0 }
 0x2bf   :  { %v683_v4 = vadd.f32 %v682_v3, %v681_v60  ;;  %2112 = vmatmul.mubr.msk.f32.gmra.mxu0 %vm628_vm3, %v690_v61  ;;  %v684_v6 = vsel %vm628_vm3, %v2326_v62, 0.0 }
 0x2c0   :  { %2114 = vmatprep.mubr.msk.f32.mxu0 %vm2551_vm1, %v2550_v14 }
 0x2c1   :  { %v685_v7 = vadd.f32 %v684_v6, %v683_v4 }
 0x2c3   :  { %2329 = vrcp.f32 %v685_v7  ;;  %2115 = vmatmul.mubr.msk.f32.gmra.mxu0 %vm628_vm3, %v691_v8 }
 0x2c4   :  { %v2328_v9 = vpop.eup %2327  ;;  %2117 = vmatprep.mubr.msk.f32.mxu0 %vm2551_vm1, %v2550_v14 }
 0x2c5   :  { %v692_v10 = vmul.f32 %v2328_v9, %v2314_v48  ;;  %v693_v11 = vmul.f32 %v2328_v9, %v2316_v49  ;;  %v694_v12 = vmul.f32 %v2328_v9, %v2318_v51  ;;  %v870_v9 = vsub.s32 3, %v2803_v63 }
 0x2c7   :  { %2118 = vmatmul.mubr.msk.f32.gmra.mxu0 %vm628_vm3, %v692_v10  ;;  %v871_v10 = vrot.slane %v2810_v5, %v870_v9 }
 0x2c8   :  { %2120 = vmatprep.mubr.msk.f32.mxu0 %vm2551_vm1, %v2550_v14 }
 0x2cb   :  { %2121 = vmatmul.mubr.msk.f32.gmra.mxu0 %vm628_vm3, %v693_v11 }
 0x2cc   :  { %2123 = vmatprep.mubr.msk.f32.mxu0 %vm2551_vm1, %v2550_v14 }
 0x2cf   :  { %2124 = vmatmul.mubr.msk.f32.gmra.mxu0 %vm628_vm3, %v694_v12 }
 0x2d0   :  { %v2330_v13 = vpop.eup %2329  ;;  %2126 = vmatprep.mubr.msk.f32.mxu0 %vm2551_vm1, %v2550_v14 }
 0x2d1   :  { %v695_v15 = vmul.f32 %v2330_v13, %v2322_v58  ;;  %v696_v16 = vmul.f32 %v2330_v13, %v2324_v59  ;;  %v697_v17 = vmul.f32 %v2330_v13, %v2326_v62 }
 0x2d3   :  { %2127 = vmatmul.mubr.msk.f32.gmra.mxu0 %vm628_vm3, %v695_v15 }
 0x2d4   :  { %2129 = vmatprep.mubr.msk.f32.mxu0 %vm2551_vm1, %v2550_v14 }
 0x2d7   :  { %2130 = vmatmul.mubr.msk.f32.gmra.mxu0 %vm628_vm3, %v696_v16 }
 0x2d8   :  { %2132 = vmatprep.mubr.msk.f32.mxu0 %vm2551_vm1, %v2550_v14 }
 0x2db   :  { %2133 = vmatmul.mubr.msk.f32.gmra.mxu0 %vm628_vm3, %v697_v17 }
 0x2dc   :  { %2160 = vmatprep.mubr.msk.f32.mxu0 %vm2551_vm1, %v2550_v14 }
 0x37b   :  { %v796_v23 = vpop.f32.mrf.mxu0 }
 0x37c   :  { %v840_v27 = vmul.f32 %v796_v23, %v465_v24 }
 0x37d   :  { %v2110_v25 = vpop.f32.mrf.mxu0 }
 0x37e   :  { %v849_v34 = vsel %vm155_vm0, %v840_v27, 0.0 }
 0x37f   :  { %v801_v28 = vpop.f32.mrf.mxu0 }
 0x380   :  { %v841_v30 = vmul.f32 %v801_v28, %v470_v26 }
 0x381   :  { %v2113_v31 = vpop.f32.mrf.mxu0 }
 0x382   :  { %v850_v36 = vsel %vm155_vm0, %v841_v30, 0.0  ;;  %v1016_v30 = vld [vmem:[%s3175_s7 + $0x18] sm:$0xff] }
 0x383   :  { %v851_v37 = vadd.f32 %v850_v36, %v849_v34  ;;  %v806_v38 = vpop.f32.mrf.mxu0  ;;  %2153 = vmatpush3.msra.mxu0 %v1016_v30  ;;  %v1144_v30 = vld [vmem:[%s3177_s9 + $0x28] sm:$0xff] }
 0x384   :  { %v842_v39 = vmul.f32 %v806_v38, %v475_v33  ;;  %2154 = vmatprep.subr.mxu0 %v2550_v14  ;;  %v1014_v38 = vld [vmem:[%s3175_s7 + $0x8] sm:$0xff] }
 0x385   :  { %v2116_v40 = vpop.f32.mrf.mxu0 }
 0x386   :  { %v852_v41 = vsel %vm155_vm0, %v842_v39, 0.0  ;;  %v1013_v39 = vld [vmem:[%s3175_s7] sm:$0xff] }
 0x387   :  { %v853_v29 = vadd.f32 %v852_v41, %v851_v37  ;;  %v811_v42 = vpop.f32.mrf.mxu0  ;;  %v1015_v37 = vld [vmem:[%s3175_s7 + $0x10] sm:$0xff] }
 0x388   :  { %v843_v32 = vmul.f32 %v811_v42, %v465_v24  ;;  %2155 = vmatpush3.msra.mxu0 %v1015_v37  ;;  %v1140_v37 = vld [vmem:[%s3177_s9 + $0x8] sm:$0xff] }
 0x389   :  { %v2119_v43 = vpop.f32.mrf.mxu0  ;;  %2144 = vmatmul.mubr.msk.f32.vlgmr.msra.gmra.mxu1 %vm155_vm0, %v853_v29  ;;  %2156 = vmatprep.subr.mxu0 %v2550_v14 }
 0x38a   :  { %2146 = vmatprep.mubr.msk.f32.mxu1 %vm2551_vm1, %v2550_v14  ;;  %v854_v46 = vsel %vm155_vm0, %v843_v32, 0.0  ;;  %2157 = vmatpush3.msra.mxu0 %v1014_v38  ;;  %v1139_v38 = vld [vmem:[%s3177_s9] sm:$0xff] }
 0x38b   :  { %v816_v35 = vpop.f32.mrf.mxu0  ;;  %2158 = vmatprep.subr.mxu0 %v2550_v14 }
 0x38c   :  { %v844_v44 = vmul.f32 %v816_v35, %v470_v26  ;;  %2159 = vmatpush3.msra.mxu0 %v1013_v39  ;;  %v1891_v39 = vld [vmem:[#allocation5] ss:$0 sm:$0xff] }
 0x38d   :  { %v2122_v45 = vpop.f32.mrf.mxu0  ;;  %2210 = vmatprep.subr.mxu0 %v2550_v14 }
 0x38e   :  { %v855_v47 = vsel %vm155_vm0, %v844_v44, 0.0 }
 0x38f   :  { %v856_v48 = vadd.f32 %v855_v47, %v854_v46  ;;  %v821_v49 = vpop.f32.mrf.mxu0 }
 0x390   :  { %v845_v50 = vmul.f32 %v821_v49, %v475_v33 }
 0x391   :  { %v2125_v51 = vpop.f32.mrf.mxu0 }
 0x392   :  { %v857_v52 = vsel %vm155_vm0, %v845_v50, 0.0 }
 0x393   :  { %v858_v53 = vadd.f32 %v857_v52, %v856_v48  ;;  %v826_v54 = vpop.f32.mrf.mxu0 }
 0x394   :  { %v846_v56 = vmul.f32 %v826_v54, %v465_v24 }
 0x395   :  { %v2128_v55 = vpop.f32.mrf.mxu0  ;;  %2147 = vmatmul.mubr.msk.f32.gmra.mxu1 %vm155_vm0, %v858_v53 }
 0x396   :  { %2149 = vmatprep.mubr.msk.f32.mxu1 %vm2551_vm1, %v2550_v14  ;;  %v859_v60 = vsel %vm155_vm0, %v846_v56, 0.0 }
 0x397   :  { %v831_v57 = vpop.f32.mrf.mxu0 }
 0x398   :  { %v847_v58 = vmul.f32 %v831_v57, %v470_v26 }
 0x399   :  { %v2131_v59 = vpop.f32.mrf.mxu0 }
 0x39a   :  { %v860_v61 = vsel %vm155_vm0, %v847_v58, 0.0  ;;  %v1245_v58 = vld [vmem:[#allocation7 + $0x18] sm:$0xff] }
 0x39b   :  { %v861_v62 = vadd.f32 %v860_v61, %v859_v60  ;;  %v836_v3 = vpop.f32.mrf.mxu0 }
 0x39c   :  { %v848_v4 = vmul.f32 %v836_v3, %v475_v33 }
 0x39d   :  { %v2134_v6 = vpop.f32.mrf.mxu0 }
 0x39e   :  { %v862_v7 = vsel %vm155_vm0, %v848_v4, 0.0  ;;  %v1243_v4 = vld [vmem:[#allocation7 + $0x8] sm:$0xff] }
 0x39f   :  { %v863_v8 = vadd.f32 %v862_v7, %v861_v62  ;;  %v1244_v62 = vld [vmem:[#allocation7 + $0x10] sm:$0xff]  ;;  %v1242_v7 = vld [vmem:[#allocation7] sm:$0xff] }
 0x3a1   :  { %2150 = vmatmul.mubr.msk.f32.gmra.mxu1 %vm155_vm0, %v863_v8 }
 0x3a2   :  { %2201 = vmatprep.mubr.msk.f32.mxu1 %vm2551_vm1, %v2550_v14 }
 0x449   :  { %v947_v11 = vpop.f32.mrf.mxu1 }
 0x44a   :  { %v948_v12 = vadd.f32 %v947_v11, %v871_v10 }
 0x44b   :  { %v2145_v13 = vpop.f32.mrf.mxu1 }
 0x44c   :  { %v2938_v15 = vadd.f32 %v948_v12, %v2684_v1 }
 0x44e   :  { %v964_v16 = vsel %vm155_vm0, %v2938_v15, 0.0  ;;  %v976_v17 = vmul.f32 %v2938_v15, %v2938_v15 }
 0x44f   :  { %965 = vadd.xlane.f32.xlu0 %v964_v16 }
 0x450   :  { %v979_v18 = vsel %vm155_vm0, %v976_v17, 0.0  ;;  %v1369_v17 = vld [vmem:[#allocation8 + $0x18] sm:$0xff] }
 0x451   :  { %980 = vadd.xlane.f32.xlu1 %v979_v18  ;;  %v1368_v18 = vld [vmem:[#allocation8 + $0x10] sm:$0xff] }
 0x455   :  { %v952_v19 = vpop.f32.mrf.mxu1 }
 0x456   :  { %v953_v20 = vadd.f32 %v952_v19, %v871_v10  ;;  %v1367_v19 = vld [vmem:[#allocation8 + $0x8] sm:$0xff] }
 0x457   :  { %v2148_v21 = vpop.f32.mrf.mxu1 }
 0x458   :  { %v2946_v22 = vadd.f32 %v953_v20, %v2682_v0  ;;  %v1366_v20 = vld [vmem:[#allocation8] sm:$0xff] }
 0x459   :  { %v1154_v21 = vld [vmem:[%s3177_s9 + $0x78] sm:$0xff] }
 0x45a   :  { %v967_v23 = vsel %vm155_vm0, %v2946_v22, 0.0  ;;  %v977_v24 = vmul.f32 %v2946_v22, %v2946_v22  ;;  %2170 = vmatpush3.msra.mxu1 %v1154_v21 }
 0x45b   :  { %968 = vadd.xlane.f32.xlu0 %v967_v23  ;;  %2171 = vmatprep.subr.mxu1 %v2550_v14  ;;  %v1150_v23 = vld [vmem:[%s3177_s9 + $0x58] sm:$0xff] }
 0x45c   :  { %v982_v25 = vsel %vm155_vm0, %v977_v24, 0.0  ;;  %v1149_v24 = vld [vmem:[%s3177_s9 + $0x50] sm:$0xff] }
 0x45d   :  { %983 = vadd.xlane.f32.xlu1 %v982_v25  ;;  %v1148_v25 = vld [vmem:[%s3177_s9 + $0x48] sm:$0xff] }
 0x461   :  { %v957_v26 = vpop.f32.mrf.mxu1 }
 0x462   :  { %v958_v27 = vadd.f32 %v957_v26, %v871_v10  ;;  %v1147_v26 = vld [vmem:[%s3177_s9 + $0x40] sm:$0xff] }
 0x463   :  { %v2151_v28 = vpop.f32.mrf.mxu1 }
 0x464   :  { %v2957_v31 = vadd.f32 %v958_v27, %v2686_v2  ;;  %v1146_v27 = vld [vmem:[%s3177_s9 + $0x38] sm:$0xff]  ;;  %v1145_v28 = vld [vmem:[%s3177_s9 + $0x30] sm:$0xff] }
 0x466   :  { %v970_v33 = vsel %vm155_vm0, %v2957_v31, 0.0  ;;  %v978_v34 = vmul.f32 %v2957_v31, %v2957_v31 }
 0x467   :  { %971 = vadd.xlane.f32.xlu0 %v970_v33  ;;  %v1143_v33 = vld [vmem:[%s3177_s9 + $0x20] sm:$0xff] }
 0x468   :  { %v985_v36 = vsel %vm155_vm0, %v978_v34, 0.0  ;;  %v1142_v34 = vld [vmem:[%s3177_s9 + $0x18] sm:$0xff] }
 0x469   :  { %986 = vadd.xlane.f32.xlu1 %v985_v36  ;;  %v1141_v36 = vld [vmem:[%s3177_s9 + $0x10] sm:$0xff] }
 0x4d8   :  { %v966_v40 = vpop.xlane.xlu0 %965 }
 0x4d9   :  { %v973_v41 = vmul.f32 0.03125, %v966_v40 }
 0x4da   :  { %v981_v29 = vpop.xlane.xlu1 %980 }
 0x4db   :  { %v991_v42 = vmul.f32 %v973_v41, %v973_v41  ;;  %v988_v43 = vmul.f32 0.03125, %v981_v29  ;;  %v1000_v53 = vsub.f32 %v2938_v15, %v973_v41 }
 0x4dd   :  { %v994_v32 = vsub.f32 %v988_v43, %v991_v42 }
 0x4df   :  { %v997_v35 = vmax.f32 %v994_v32, 0.0 }
 0x4e1   :  { %v1003_v44 = vadd.f32 1e-05, %v997_v35 }
 0x4e3   :  { %2331 = vrsqrt.f32 %v1003_v44 }
 0x4e4   :  { %v969_v45 = vpop.xlane.xlu0 %968 }
 0x4e5   :  { %v974_v46 = vmul.f32 0.03125, %v969_v45 }
 0x4e6   :  { %v984_v47 = vpop.xlane.xlu1 %983 }
 0x4e7   :  { %v992_v48 = vmul.f32 %v974_v46, %v974_v46  ;;  %v989_v49 = vmul.f32 0.03125, %v984_v47  ;;  %v1001_v9 = vsub.f32 %v2946_v22, %v974_v46 }
 0x4e9   :  { %v995_v50 = vsub.f32 %v989_v49, %v992_v48 }
 0x4eb   :  { %v998_v51 = vmax.f32 %v995_v50, 0.0 }
 0x4ed   :  { %v1004_v52 = vadd.f32 1e-05, %v998_v51 }
 0x4ef   :  { %2333 = vrsqrt.f32 %v1004_v52 }
 0x4f0   :  { %v2332_v54 = vpop.eup %2331  ;;  %v972_v55 = vpop.xlane.xlu0 %971 }
 0x4f1   :  { %v975_v56 = vmul.f32 0.03125, %v972_v55  ;;  %v1009_v57 = vmul.f32 %v2332_v54, %v1000_v53 }
 0x4f2   :  { %v987_v59 = vpop.xlane.xlu1 %986 }
 0x4f3   :  { %v993_v60 = vmul.f32 %v975_v56, %v975_v56  ;;  %v990_v61 = vmul.f32 0.03125, %v987_v59  ;;  %2161 = vmatmul.mubr.msk.f32.vlgmr.msra.gmra.mxu0 %vm155_vm0, %v1009_v57  ;;  %v1002_v12 = vsub.f32 %v2957_v31, %v975_v56 }
 0x4f4   :  { %2163 = vmatprep.mubr.msk.f32.mxu0 %vm2551_vm1, %v2550_v14  ;;  %2211 = vmatpush3.msra.mxu0 %v1245_v58 }
 0x4f5   :  { %v996_v3 = vsub.f32 %v990_v61, %v993_v60  ;;  %2212 = vmatprep.subr.mxu0 %v2550_v14 }
 0x4f6   :  { %2213 = vmatpush3.msra.mxu0 %v1244_v62 }
 0x4f7   :  { %v999_v6 = vmax.f32 %v996_v3, 0.0  ;;  %2214 = vmatprep.subr.mxu0 %v2550_v14 }
 0x4f8   :  { %2215 = vmatpush3.msra.mxu0 %v1243_v4  ;;  %v1485_v4 = vld [vmem:[#allocation10 + $0x18] sm:$0xff] }
 0x4f9   :  { %v1005_v8 = vadd.f32 1e-05, %v999_v6  ;;  %2216 = vmatprep.subr.mxu0 %v2550_v14 }
 0x4fa   :  { %2217 = vmatpush3.msra.mxu0 %v1242_v7 }
 0x4fb   :  { %2335 = vrsqrt.f32 %v1005_v8  ;;  %2227 = vmatprep.subr.mxu0 %v2550_v14  ;;  %v1484_v8 = vld [vmem:[#allocation10 + $0x10] sm:$0xff] }
 0x4fc   :  { %v2334_v10 = vpop.eup %2333 }
 0x4fd   :  { %v1010_v11 = vmul.f32 %v2334_v10, %v1001_v9 }
 0x4ff   :  { %2164 = vmatmul.mubr.msk.f32.gmra.mxu0 %vm155_vm0, %v1010_v11  ;;  %v1372_v11 = vsub.s32 5, %v2803_v63 }
 0x500   :  { %2166 = vmatprep.mubr.msk.f32.mxu0 %vm2551_vm1, %v2550_v14 }
 0x501   :  { %v1373_v21 = vrot.slane %v2810_v5, %v1372_v11  ;;  %v1600_v11 = vld [vmem:[#allocation11 + $0x10] sm:$0xff] }
 0x508   :  { %v2336_v13 = vpop.eup %2335 }
 0x509   :  { %v1011_v16 = vmul.f32 %v2336_v13, %v1002_v12  ;;  %v1483_v13 = vld [vmem:[#allocation10 + $0x8] sm:$0xff] }
 0x50b   :  { %2167 = vmatmul.mubr.msk.f32.gmra.mxu0 %vm155_vm0, %v1011_v16 }
 0x50c   :  { %2218 = vmatprep.mubr.msk.f32.mxu0 %vm2551_vm1, %v2550_v14 }
 0x50f   :  { %2219 = vmatmul.mubr.msk.f32.vlgmr.msra.gmra.mxu0 %vm155_vm0, %v2684_v1 }
 0x510   :  { %2228 = vmatpush3.msra.mxu0 %v1369_v17  ;;  %2221 = vmatprep.mubr.msk.f32.mxu0 %vm2551_vm1, %v2550_v14 }
 0x511   :  { %2229 = vmatprep.subr.mxu0 %v2550_v14 }
 0x512   :  { %2230 = vmatpush3.msra.mxu0 %v1368_v18  ;;  %v1482_v18 = vld [vmem:[#allocation10] sm:$0xff] }
 0x513   :  { %2222 = vmatmul.mubr.msk.f32.gmra.mxu0 %vm155_vm0, %v2682_v0  ;;  %2231 = vmatprep.subr.mxu0 %v2550_v14 }
 0x514   :  { %2232 = vmatpush3.msra.mxu0 %v1367_v19  ;;  %2224 = vmatprep.mubr.msk.f32.mxu0 %vm2551_vm1, %v2550_v14 }
 0x515   :  { %2233 = vmatprep.subr.mxu0 %v2550_v14 }
 0x516   :  { %2234 = vmatpush3.msra.mxu0 %v1366_v20 }
 0x517   :  { %2225 = vmatmul.mubr.msk.f32.gmra.mxu0 %vm155_vm0, %v2686_v2  ;;  %2272 = vmatprep.subr.mxu0 %v2550_v14 }
 0x518   :  { %2235 = vmatprep.mubr.msk.f32.mxu0 %vm2551_vm1, %v2550_v14 }
 0x51b   :  { %2236 = vmatmul.mubr.msk.f32.vlgmr.msra.gmra.mxu0 %vm155_vm0, %v2684_v1  ;;  %v1152_v1 = vld [vmem:[%s3177_s9 + $0x68] sm:$0xff] }
 0x51c   :  { %2238 = vmatprep.mubr.msk.f32.mxu0 %vm2551_vm1, %v2550_v14 }
 0x51f   :  { %2239 = vmatmul.mubr.msk.f32.gmra.mxu0 %vm155_vm0, %v2682_v0  ;;  %v1153_v0 = vld [vmem:[%s3177_s9 + $0x70] sm:$0xff] }
 0x520   :  { %2241 = vmatprep.mubr.msk.f32.mxu0 %vm2551_vm1, %v2550_v14  ;;  %2172 = vmatpush3.msra.mxu1 %v1153_v0 }
 0x521   :  { %2173 = vmatprep.subr.mxu1 %v2550_v14 }
 0x522   :  { %2174 = vmatpush3.msra.mxu1 %v1152_v1 }
 0x523   :  { %2242 = vmatmul.mubr.msk.f32.gmra.mxu0 %vm155_vm0, %v2686_v2  ;;  %2175 = vmatprep.subr.mxu1 %v2550_v14  ;;  %v1151_v2 = vld [vmem:[%s3177_s9 + $0x60] sm:$0xff] }
 0x524   :  { %2280 = vmatprep.mubr.msk.f32.mxu0 %vm2551_vm1, %v2550_v14  ;;  %2176 = vmatpush3.msra.mxu1 %v1151_v2 }
 0x525   :  { %2177 = vmatprep.subr.mxu1 %v2550_v14 }
 0x526   :  { %2178 = vmatpush3.msra.mxu1 %v1150_v23 }
 0x527   :  { %2179 = vmatprep.subr.mxu1 %v2550_v14 }
 0x528   :  { %2180 = vmatpush3.msra.mxu1 %v1149_v24 }
 0x529   :  { %2181 = vmatprep.subr.mxu1 %v2550_v14 }
 0x52a   :  { %2182 = vmatpush3.msra.mxu1 %v1148_v25 }
 0x52b   :  { %2183 = vmatprep.subr.mxu1 %v2550_v14 }
 0x52c   :  { %2184 = vmatpush3.msra.mxu1 %v1147_v26 }
 0x52d   :  { %2185 = vmatprep.subr.mxu1 %v2550_v14 }
 0x52e   :  { %2186 = vmatpush3.msra.mxu1 %v1146_v27 }
 0x52f   :  { %2187 = vmatprep.subr.mxu1 %v2550_v14 }
 0x530   :  { %2188 = vmatpush3.msra.mxu1 %v1145_v28 }
 0x531   :  { %2189 = vmatprep.subr.mxu1 %v2550_v14 }
 0x532   :  { %2190 = vmatpush3.msra.mxu1 %v1144_v30 }
 0x533   :  { %2191 = vmatprep.subr.mxu1 %v2550_v14 }
 0x534   :  { %2192 = vmatpush3.msra.mxu1 %v1143_v33 }
 0x535   :  { %2193 = vmatprep.subr.mxu1 %v2550_v14 }
 0x536   :  { %2194 = vmatpush3.msra.mxu1 %v1142_v34 }
 0x537   :  { %2195 = vmatprep.subr.mxu1 %v2550_v14 }
 0x538   :  { %2196 = vmatpush3.msra.mxu1 %v1141_v36 }
 0x539   :  { %2197 = vmatprep.subr.mxu1 %v2550_v14 }
 0x53a   :  { %2198 = vmatpush3.msra.mxu1 %v1140_v37 }
 0x53b   :  { %2199 = vmatprep.subr.mxu1 %v2550_v14 }
 0x53c   :  { %2200 = vmatpush3.msra.mxu1 %v1139_v38 }
 0x53d   :  { %2244 = vmatprep.subr.mxu1 %v2550_v14 }
 0x5b3   :  { %v1098_v40 = vpop.f32.mrf.mxu0 }
 0x5b4   :  { %v1099_v41 = vadd.f32 %v1891_v39, %v1098_v40 }
 0x5b5   :  { %v2162_v29 = vpop.f32.mrf.mxu0 }
 0x5b6   :  { %v1115_v42 = vmul.f32 0.044715, %v1099_v41  ;;  %v1112_v57 = vmul.f32 0.5, %v1099_v41 }
 0x5b8   :  { %v1118_v43 = vmul.f32 %v1115_v42, %v1099_v41 }
 0x5ba   :  { %v1121_v32 = vmul.f32 %v1118_v43, %v1099_v41 }
 0x5bc   :  { %v1124_v35 = vadd.f32 %v1121_v32, %v1099_v41 }
 0x5be   :  { %v1127_v44 = vmul.f32 0.7978846, %v1124_v35 }
 0x5bf   :  { %v1103_v45 = vpop.f32.mrf.mxu0 }
 0x5c0   :  { %2337 = vtanh.f32 %v1127_v44  ;;  %v1104_v46 = vadd.f32 %v1891_v39, %v1103_v45 }
 0x5c1   :  { %v2165_v47 = vpop.f32.mrf.mxu0 }
 0x5c2   :  { %v1116_v48 = vmul.f32 0.044715, %v1104_v46  ;;  %v1113_v2 = vmul.f32 0.5, %v1104_v46 }
 0x5c4   :  { %v1119_v49 = vmul.f32 %v1116_v48, %v1104_v46 }
 0x5c6   :  { %v1122_v50 = vmul.f32 %v1119_v49, %v1104_v46 }
 0x5c8   :  { %v1125_v51 = vadd.f32 %v1122_v50, %v1104_v46 }
 0x5ca   :  { %v1128_v52 = vmul.f32 0.7978846, %v1125_v51 }
 0x5cb   :  { %v1108_v53 = vpop.f32.mrf.mxu0 }
 0x5cc   :  { %v3085_v54 = vadd.f32 %v1891_v39, %v1108_v53  ;;  %2339 = vtanh.f32 %v1128_v52 }
 0x5cd   :  { %v2338_v55 = vpop.eup %2337  ;;  %v2168_v56 = vpop.f32.mrf.mxu0 }
 0x5ce   :  { %v1117_v58 = vmul.f32 0.044715, %v3085_v54  ;;  %v1133_v59 = vadd.f32 1.0, %v2338_v55  ;;  %v1114_v43 = vmul.f32 0.5, %v3085_v54 }
 0x5cf   :  { %v1321_v60 = vpop.f32.mrf.mxu0 }
 0x5d0   :  { %v1120_v61 = vmul.f32 %v1117_v58, %v3085_v54  ;;  %v1336_v62 = vsel %vm1335_vm4, %v1321_v60, -inf  ;;  %v1136_v3 = vmul.f32 %v1133_v59, %v1112_v57 }
 0x5d1   :  { %1337 = vmax.xlane.f32.xlu0 %v1336_v62  ;;  %v2220_v6 = vpop.f32.mrf.mxu0 }
 0x5d2   :  { %2202 = vmatmul.mubr.f32.vlgmr.msra.gmra.mxu1 %v1136_v3  ;;  %v1123_v7 = vmul.f32 %v1120_v61, %v3085_v54  ;;  %v1682_v6 = vld [vmem:[#allocation13 + $0x18] sm:$0xff] }
 0x5d3   :  { %v1326_v9 = vpop.f32.mrf.mxu0  ;;  %2204 = vmatprep.mubr.msk.f32.mxu1 %vm2551_vm1, %v2550_v14  ;;  %2245 = vmatpush3.msra.mxu1 %v1485_v4 }
 0x5d4   :  { %v1339_v10 = vsel %vm1335_vm4, %v1326_v9, -inf  ;;  %v1126_v12 = vadd.f32 %v1123_v7, %v3085_v54  ;;  %2246 = vmatprep.subr.mxu1 %v2550_v14  ;;  %2273 = vmatpush3.msra.mxu0 %v1682_v6  ;;  %v1681_v7 = vld [vmem:[#allocation13 + $0x10] sm:$0xff]  ;;  %v1679_v9 = vld [vmem:[#allocation13] sm:$0xff] }
 0x5d5   :  { %1340 = vmax.xlane.f32.xlu1 %v1339_v10  ;;  %v2223_v16 = vpop.f32.mrf.mxu0  ;;  %2247 = vmatpush3.msra.mxu1 %v1484_v8  ;;  %v1680_v8 = vld [vmem:[#allocation13 + $0x8] sm:$0xff]  ;;  %v1601_v10 = vld [vmem:[#allocation11 + $0x18] sm:$0xff] }
 0x5d6   :  { %v1129_v17 = vmul.f32 0.7978846, %v1126_v12  ;;  %2248 = vmatprep.subr.mxu1 %v2550_v14  ;;  %2274 = vmatprep.subr.mxu0 %v2550_v14  ;;  %v1599_v12 = vld [vmem:[#allocation11 + $0x8] sm:$0xff] }
 0x5d7   :  { %v1331_v19 = vpop.f32.mrf.mxu0  ;;  %2249 = vmatpush3.msra.mxu1 %v1483_v13  ;;  %2275 = vmatpush3.msra.mxu0 %v1681_v7  ;;  %v1598_v13 = vld [vmem:[#allocation11] sm:$0xff] }
 0x5d8   :  { %v1342_v20 = vsel %vm1335_vm4, %v1331_v19, -inf  ;;  %2341 = vtanh.f32 %v1129_v17  ;;  %2250 = vmatprep.subr.mxu1 %v2550_v14  ;;  %2276 = vmatprep.subr.mxu0 %v2550_v14 }
 0x5d9   :  { %v2340_v0 = vpop.eup %2339  ;;  %1343 = vmax.xlane.f32.xlu0 %v1342_v20  ;;  %v2226_v1 = vpop.f32.mrf.mxu0  ;;  %2251 = vmatpush3.msra.mxu1 %v1482_v18  ;;  %v1157_v20 = vsub.s32 4, %v2803_v63 }
 0x5da   :  { %v1134_v23 = vadd.f32 1.0, %v2340_v0  ;;  %2261 = vmatprep.subr.mxu1 %v2550_v14  ;;  %2277 = vmatpush3.msra.mxu0 %v1680_v8 }
 0x5db   :  { %v1440_v24 = vpop.f32.mrf.mxu0  ;;  %2278 = vmatprep.subr.mxu0 %v2550_v14 }
 0x5dc   :  { %v1441_v25 = vadd.f32 %v1440_v24, %v1373_v21  ;;  %v1137_v26 = vmul.f32 %v1134_v23, %v1113_v2  ;;  %2279 = vmatpush3.msra.mxu0 %v1679_v9 }
 0x5dd   :  { %v2237_v27 = vpop.f32.mrf.mxu0 }
 0x5de   :  { %v1457_v28 = vmul.f32 0.044715, %v1441_v25  ;;  %2205 = vmatmul.mubr.f32.gmra.mxu1 %v1137_v26  ;;  %v1454_v54 = vmul.f32 0.5, %v1441_v25 }
 0x5df   :  { %v1445_v30 = vpop.f32.mrf.mxu0  ;;  %2207 = vmatprep.mubr.msk.f32.mxu1 %vm2551_vm1, %v2550_v14 }
 0x5e0   :  { %v1460_v5 = vmul.f32 %v1457_v28, %v1441_v25  ;;  %v1446_v33 = vadd.f32 %v1445_v30, %v1373_v21 }
 0x5e1   :  { %v2240_v34 = vpop.f32.mrf.mxu0 }
 0x5e2   :  { %v1463_v36 = vmul.f32 %v1460_v5, %v1441_v25  ;;  %v1458_v37 = vmul.f32 0.044715, %v1446_v33  ;;  %v1455_v58 = vmul.f32 0.5, %v1446_v33  ;;  %v2368_v5 = vld [vmem:[#allocation2] sm:$0xff] }
 0x5e3   :  { %v1450_v38 = vpop.f32.mrf.mxu0 }
 0x5e4   :  { %v1466_v39 = vadd.f32 %v1463_v36, %v1441_v25  ;;  %v1461_v40 = vmul.f32 %v1458_v37, %v1446_v33  ;;  %v1451_v41 = vadd.f32 %v1450_v38, %v1373_v21  ;;  %v3126_v21 = vld [vmem:[%s3184_s16] sm:$0xff] }
 0x5e5   :  { %v2342_v29 = vpop.eup %2341  ;;  %v2243_v42 = vpop.f32.mrf.mxu0  ;;  %v1158_v0 = vrot.slane %v3126_v21, %v1157_v20 }
 0x5e6   :  { %v1469_v32 = vmul.f32 0.7978846, %v1466_v39  ;;  %v1464_v35 = vmul.f32 %v1461_v40, %v1446_v33  ;;  %v1459_v44 = vmul.f32 0.044715, %v1451_v41  ;;  %v1135_v45 = vadd.f32 1.0, %v2342_v29  ;;  %v2369_v42 = vld [vmem:[#allocation2 + $0x8] sm:$0xff] }
 0x5e7   :  { %v1456_v62 = vmul.f32 0.5, %v1451_v41 }
 0x5e8   :  { %2343 = vtanh.f32 %v1469_v32  ;;  %v1467_v46 = vadd.f32 %v1464_v35, %v1446_v33  ;;  %v1462_v47 = vmul.f32 %v1459_v44, %v1451_v41  ;;  %v1138_v48 = vmul.f32 %v1135_v45, %v1114_v43 }
 0x5ea   :  { %v1465_v49 = vmul.f32 %v1462_v47, %v1451_v41  ;;  %2208 = vmatmul.mubr.f32.gmra.mxu1 %v1138_v48  ;;  %v1470_v50 = vmul.f32 0.7978846, %v1467_v46 }
 0x5eb   :  { %2252 = vmatprep.mubr.msk.f32.mxu1 %vm2551_vm1, %v2550_v14 }
 0x5ec   :  { %v1468_v51 = vadd.f32 %v1465_v49, %v1451_v41  ;;  %2345 = vtanh.f32 %v1470_v50 }
 0x5ee   :  { %v1471_v52 = vmul.f32 0.7978846, %v1468_v51  ;;  %v2370_v51 = vld [vmem:[#allocation2 + $0x10] sm:$0xff] }
 0x5f0   :  { %2347 = vtanh.f32 %v1471_v52 }
 0x5f5   :  { %v2344_v53 = vpop.eup %2343 }
 0x5f6   :  { %v1475_v55 = vadd.f32 1.0, %v2344_v53 }
 0x5f8   :  { %v1478_v56 = vmul.f32 %v1475_v55, %v1454_v54  ;;  %v1901_v54 = vld [vmem:[%s3181_s13] ss:$0 sm:$0xff] }
 0x5f9   :  { %v2346_v57 = vpop.eup %2345 }
 0x5fa   :  { %2253 = vmatmul.mubr.msk.f32.vlgmr.msra.gmra.mxu1 %vm155_vm0, %v1478_v56  ;;  %v1476_v59 = vadd.f32 1.0, %v2346_v57 }
 0x5fb   :  { %2255 = vmatprep.mubr.msk.f32.mxu1 %vm2551_vm1, %v2550_v14  ;;  %2262 = vmatpush3.msra.mxu1 %v1601_v10 }
 0x5fc   :  { %v1479_v60 = vmul.f32 %v1476_v59, %v1455_v58  ;;  %2263 = vmatprep.subr.mxu1 %v2550_v14 }
 0x5fd   :  { %v2348_v61 = vpop.eup %2347  ;;  %2264 = vmatpush3.msra.mxu1 %v1600_v11 }
 0x5fe   :  { %2256 = vmatmul.mubr.msk.f32.gmra.mxu1 %vm155_vm0, %v1479_v60  ;;  %v1477_v3 = vadd.f32 1.0, %v2348_v61  ;;  %2265 = vmatprep.subr.mxu1 %v2550_v14 }
 0x5ff   :  { %2258 = vmatprep.mubr.msk.f32.mxu1 %vm2551_vm1, %v2550_v14  ;;  %2266 = vmatpush3.msra.mxu1 %v1599_v12 }
 0x600   :  { %v1480_v4 = vmul.f32 %v1477_v3, %v1456_v62  ;;  %2267 = vmatprep.subr.mxu1 %v2550_v14 }
 0x601   :  { %2268 = vmatpush3.msra.mxu1 %v1598_v13 }
 0x602   :  { %2259 = vmatmul.mubr.msk.f32.gmra.mxu1 %vm155_vm0, %v1480_v4 }
 0x603   :  { %2269 = vmatprep.mubr.msk.f32.mxu1 %vm2551_vm1, %v2550_v14 }
 0x65a   :  { %v1338_v16 = vpop.xlane.xlu0 %1337 }
 0x65b   :  { %v1345_v17 = vmul.f32 0.5, %v1338_v16 }
 0x65d   :  { %2349 = vtanh.f32 %v1345_v17 }
 0x65e   :  { %v1341_v18 = vpop.xlane.xlu1 %1340 }
 0x65f   :  { %v1346_v19 = vmul.f32 0.5, %v1341_v18 }
 0x661   :  { %2351 = vtanh.f32 %v1346_v19 }
 0x662   :  { %v1344_v25 = vpop.xlane.xlu0 %1343 }
 0x663   :  { %v1347_v30 = vmul.f32 0.5, %v1344_v25 }
 0x665   :  { %2353 = vtanh.f32 %v1347_v30 }
 0x66a   :  { %v2350_v1 = vpop.eup %2349 }
 0x66b   :  { %v1351_v23 = vadd.f32 1.0, %v2350_v1 }
 0x66d   :  { %v1354_v28 = vmul.f32 0.5, %v1351_v23 }
 0x66e   :  { %v2352_v37 = vpop.eup %2351 }
 0x66f   :  { %v1352_v39 = vadd.f32 1.0, %v2352_v37 }
 0x672   :  { %v2354_v44 = vpop.eup %2353 }
 0x673   :  { %v1353_v46 = vadd.f32 1.0, %v2354_v44 }
 0x675   :  { %v1356_v50 = vmul.f32 0.5, %v1353_v46 }
 0x692   :  { %v1225_v2 = vpop.f32.mrf.mxu1 }
 0x693   :  { %v1226_v24 = vadd.f32 %v1225_v2, %v1158_v0 }
 0x694   :  { %v2203_v26 = vpop.f32.mrf.mxu1 }
 0x695   :  { %v1239_v27 = vadd.f32 %v1226_v24, %v2938_v15  ;;  %v1355_v15 = vmul.f32 0.5, %v1352_v39 }
 0x697   :  { %v1357_v33 = vsub.f32 %v1239_v27, %v2368_v5  ;;  %v1604_v27 = vsub.s32 6, %v2803_v63 }
 0x699   :  { %v1360_v34 = vmul.f32 %v1357_v33, %v1354_v28  ;;  %v1605_v28 = vrot.slane %v3126_v21, %v1604_v27 }
 0x69b   :  { %v1363_v36 = vadd.f32 %v2368_v5, %v1360_v34 }
 0x69d   :  { %2281 = vmatmul.mubr.msk.f32.vlgmr.msra.gmra.mxu0 %vm155_vm0, %v1363_v36 }
 0x69e   :  { %v1230_v38 = vpop.f32.mrf.mxu1  ;;  %2283 = vmatprep.mubr.msk.f32.mxu0 %vm2551_vm1, %v2550_v14 }
 0x69f   :  { %v1231_v40 = vadd.f32 %v1230_v38, %v1158_v0 }
 0x6a0   :  { %v2206_v41 = vpop.f32.mrf.mxu1 }
 0x6a1   :  { %v1240_v29 = vadd.f32 %v1231_v40, %v2946_v22 }
 0x6a3   :  { %v1358_v43 = vsub.f32 %v1240_v29, %v2369_v42 }
 0x6a5   :  { %v1361_v32 = vmul.f32 %v1358_v43, %v1355_v15 }
 0x6a7   :  { %v1364_v35 = vadd.f32 %v2369_v42, %v1361_v32 }
 0x6a9   :  { %2284 = vmatmul.mubr.msk.f32.gmra.mxu0 %vm155_vm0, %v1364_v35 }
 0x6aa   :  { %v1235_v45 = vpop.f32.mrf.mxu1  ;;  %2286 = vmatprep.mubr.msk.f32.mxu0 %vm2551_vm1, %v2550_v14 }
 0x6ab   :  { %v1236_v47 = vadd.f32 %v1235_v45, %v1158_v0 }
 0x6ac   :  { %v2209_v48 = vpop.f32.mrf.mxu1 }
 0x6ad   :  { %v1241_v49 = vadd.f32 %v1236_v47, %v2957_v31 }
 0x6af   :  { %v1359_v22 = vsub.f32 %v1241_v49, %v2370_v51 }
 0x6b1   :  { %v1362_v52 = vmul.f32 %v1359_v22, %v1356_v50 }
 0x6b3   :  { %v1365_v53 = vadd.f32 %v2370_v51, %v1362_v52 }
 0x6b5   :  { %2287 = vmatmul.mubr.msk.f32.gmra.mxu0 %vm155_vm0, %v1365_v53 }
 0x6ba   :  { %v1567_v55 = vpop.f32.mrf.mxu1 }
 0x6bb   :  { %v1568_v56 = vadd.f32 %v1901_v54, %v1567_v55 }
 0x6bc   :  { %v2254_v57 = vpop.f32.mrf.mxu1 }
 0x6bd   :  { %v1581_v14 = vmul.f32 0.5, %v1568_v56 }
 0x6be   :  { %v1572_v58 = vpop.f32.mrf.mxu1 }
 0x6bf   :  { %2355 = vtanh.f32 %v1581_v14  ;;  %v1573_v59 = vadd.f32 %v1901_v54, %v1572_v58 }
 0x6c0   :  { %v2257_v60 = vpop.f32.mrf.mxu1 }
 0x6c1   :  { %v1582_v31 = vmul.f32 0.5, %v1573_v59 }
 0x6c2   :  { %v1577_v61 = vpop.f32.mrf.mxu1 }
 0x6c3   :  { %2357 = vtanh.f32 %v1582_v31  ;;  %v1578_v62 = vadd.f32 %v1901_v54, %v1577_v61 }
 0x6c4   :  { %v2260_v3 = vpop.f32.mrf.mxu1 }
 0x6c5   :  { %v1583_v4 = vmul.f32 0.5, %v1578_v62 }
 0x6c7   :  { %2359 = vtanh.f32 %v1583_v4  ;;  %v1825_v4 = vsub.s32 7, %v2803_v63 }
 0x6cc   :  { %v2356_v6 = vpop.eup %2355 }
 0x6cd   :  { %v1587_v7 = vadd.f32 1.0, %v2356_v6 }
 0x6cf   :  { %v1590_v10 = vmul.f32 0.5, %v1587_v7  ;;  %v1826_v7 = vrot.slane %v3126_v21, %v1825_v4 }
 0x6d0   :  { %v2358_v8 = vpop.eup %2357 }
 0x6d1   :  { %v1588_v9 = vadd.f32 1.0, %v2358_v8  ;;  %v1593_v17 = vsel %vm155_vm0, %v1590_v10, 0.0  ;;  %v1909_v10 = vld [vmem:[%s3184_s16 + $0x8] ss:$0 sm:$0xff]  ;;  %s2511_s16 = scalar_lea.vmem %s1846_s2, 384 }
 0x6d2   :  { %p2512_p7 = scmp.ne.s32.totalorder %s1846_s2, %s2511_s16  ;;  %p2517_p9 = scmp.lt.s32.totalorder %s2511_s16, %s2511_s16 }
 0x6d3   :  { %v1591_v11 = vmul.f32 0.5, %v1588_v9 }
 0x6d4   :  { %v2360_v12 = vpop.eup %2359  ;;  %p2518_p10 = por %p2517_p9, %p2516_p8 }
 0x6d5   :  { %v1594_v13 = vsel %vm155_vm0, %v1591_v11, 0.0  ;;  %v1589_v16 = vadd.f32 1.0, %v2360_v12 }
 0x6d6   :  { %v1595_v19 = vadd.f32 %v1594_v13, %v1593_v17  ;;  %p2519_p11 = pnand %p2518_p10, %p2512_p7 }
 0x6d7   :  { %v1592_v18 = vmul.f32 0.5, %v1589_v16 }
 0x6d9   :  { %v1596_v20 = vsel %vm155_vm0, %v1592_v18, 0.0 }
 0x6da   :  { %v1597_v0 = vadd.f32 %v1596_v20, %v1595_v19 }
 0x6dc   :  { %2270 = vmatmul.mubr.msk.f32.vlgmr.msra.gmra.mxu1 %vm155_vm0, %v1597_v0 }
 0x75d   :  { %v1758_v1 = vpop.f32.mrf.mxu0 }
 0x75f   :  { %v2282_v2 = vpop.f32.mrf.mxu0 }
 0x769   :  { %v1763_v23 = vpop.f32.mrf.mxu0 }
 0x76b   :  { %v2285_v24 = vpop.f32.mrf.mxu0 }
 0x775   :  { %v1768_v25 = vpop.f32.mrf.mxu0 }
 0x777   :  { %v2288_v26 = vpop.f32.mrf.mxu0 }
 0x79c   :  { %v1675_v30 = vpop.f32.mrf.mxu1 }
 0x79d   :  { %v1676_v5 = vadd.f32 %v1675_v30, %v1605_v28 }
 0x79e   :  { %v2271_v33 = vpop.f32.mrf.mxu1 }
 0x79f   :  { %v1772_v34 = vadd.f32 %v1758_v1, %v1676_v5  ;;  %v1773_v36 = vadd.f32 %v1763_v23, %v1676_v5  ;;  %v1774_v40 = vadd.f32 %v1768_v25, %v1676_v5 }
 0x7a1   :  { %v1775_v37 = vsel %vm155_vm0, %v1772_v34, 0.0  ;;  %v1778_v38 = vsel %vm155_vm0, %v1773_v36, 0.0  ;;  %v1787_v39 = vmul.f32 %v1772_v34, %v1772_v34  ;;  %v1781_v29 = vsel %vm155_vm0, %v1774_v40, 0.0 }
 0x7a2   :  { %1776 = vadd.xlane.f32.xlu1 %v1775_v37  ;;  %1779 = vadd.xlane.f32.xlu0 %v1778_v38  ;;  %v1789_v15 = vmul.f32 %v1774_v40, %v1774_v40  ;;  %v1788_v42 = vmul.f32 %v1773_v36, %v1773_v36 }
 0x7a3   :  { %v1790_v41 = vsel %vm155_vm0, %v1787_v39, 0.0 }
 0x7a4   :  { %v1796_v43 = vsel %vm155_vm0, %v1789_v15, 0.0  ;;  %v1793_v32 = vsel %vm155_vm0, %v1788_v42, 0.0 }
 0x7a6   :  { %1791 = vadd.xlane.f32.xlu0 %v1790_v41  ;;  %1782 = vadd.xlane.f32.xlu1 %v1781_v29 }
 0x7aa   :  { %1797 = vadd.xlane.f32.xlu0 %v1796_v43  ;;  %1794 = vadd.xlane.f32.xlu1 %v1793_v32 }
 0x82b   :  { %v1777_v35 = vpop.xlane.xlu1 %1776  ;;  %v1780_v44 = vpop.xlane.xlu0 %1779 }
 0x82c   :  { %v1784_v45 = vmul.f32 0.03125, %v1777_v35  ;;  %v1785_v46 = vmul.f32 0.03125, %v1780_v44 }
 0x82e   :  { %v1802_v49 = vmul.f32 %v1784_v45, %v1784_v45  ;;  %v1803_v52 = vmul.f32 %v1785_v46, %v1785_v46  ;;  %v1811_v6 = vsub.f32 %v1772_v34, %v1784_v45  ;;  %v1812_v16 = vsub.f32 %v1773_v36, %v1785_v46 }
 0x82f   :  { %v1792_v47 = vpop.xlane.xlu0 %1791  ;;  %v1783_v48 = vpop.xlane.xlu1 %1782 }
 0x830   :  { %v1799_v50 = vmul.f32 0.03125, %v1792_v47  ;;  %v1786_v51 = vmul.f32 0.03125, %v1783_v48 }
 0x832   :  { %v1805_v22 = vsub.f32 %v1799_v50, %v1802_v49  ;;  %v1804_v56 = vmul.f32 %v1786_v51, %v1786_v51  ;;  %v1813_v11 = vsub.f32 %v1774_v40, %v1786_v51 }
 0x833   :  { %v1798_v53 = vpop.xlane.xlu0 %1797  ;;  %v1795_v54 = vpop.xlane.xlu1 %1794 }
 0x834   :  { %v1808_v55 = vmax.f32 %v1805_v22, 0.0  ;;  %v1801_v57 = vmul.f32 0.03125, %v1798_v53  ;;  %v1800_v14 = vmul.f32 0.03125, %v1795_v54 }
 0x836   :  { %v1814_v58 = vadd.f32 1e-05, %v1808_v55  ;;  %v1807_v59 = vsub.f32 %v1801_v57, %v1804_v56  ;;  %v1806_v60 = vsub.f32 %v1800_v14, %v1803_v52 }
 0x838   :  { %2361 = vrsqrt.f32 %v1814_v58  ;;  %v1810_v31 = vmax.f32 %v1807_v59, 0.0  ;;  %v1809_v61 = vmax.f32 %v1806_v60, 0.0 }
 0x83a   :  { %v1816_v62 = vadd.f32 1e-05, %v1810_v31  ;;  %v1815_v3 = vadd.f32 1e-05, %v1809_v61 }
 0x83c   :  { %2363 = vrsqrt.f32 %v1816_v62 }
 0x83d   :  { %2365 = vrsqrt.f32 %v1815_v3 }
 0x845   :  { %v2362_v8 = vpop.eup %2361 }
 0x846   :  { %v1820_v9 = vmul.f32 %v2362_v8, %v1811_v6 }
 0x848   :  { %v1827_v12 = vmul.f32 %v1826_v7, %v1820_v9 }
 0x849   :  { %v2364_v13 = vpop.eup %2363 }
 0x84a   :  { %v2366_v17 = vpop.eup %2365  ;;  %v1822_v18 = vmul.f32 %v2364_v13, %v1813_v11  ;;  %v1834_v19 = vadd.f32 %v1909_v10, %v1827_v12 }
 0x84b   :  { %v1821_v20 = vmul.f32 %v2366_v17, %v1812_v16 }
 0x84c   :  { %v1829_v0 = vmul.f32 %v1826_v7, %v1822_v18  ;;  %1837 = vst.msk [vmem:[#allocation14] sm:$0xff] %vm155_vm0, %v1834_v19 }
 0x84d   :  { %v1828_v63 = vmul.f32 %v1826_v7, %v1821_v20 }
 0x84e   :  { %v1836_v21 = vadd.f32 %v1909_v10, %v1829_v0 }
 0x84f   :  { %v1835_v1 = vadd.f32 %v1909_v10, %v1828_v63 }
 0x850   :  { %1839 = vst.msk [vmem:[#allocation14 + $0x10] sm:$0xff] %vm155_vm0, %v1836_v21 }
 0x851   :  { %1838 = vst.msk [vmem:[#allocation14 + $0x8] sm:$0xff] %vm155_vm0, %v1835_v1 }
 0x852   :  { %2522 = shalt.err (!%p2519_p11)
}
 0x853   :  { %1851 = dma.vmem_to_hbm [thread:$0]  %s1846_s2, 384, %s3185_s17, [#allocation4], %s2544_s20, %s2544_s20, %s2545_s21  }
 0x854   :  { %2539 = dma.done.wait [#allocation4], 384  }
 0x855   :  { %2540 = vsyncadd [#allocation4], 4294966912 }
 0x856   :  { %1855 = vsyncpa [#allocation3], 1 }
 0x857   :  { %1856 = vsyncpa [#allocation6], 1 }
 0x858   :  { %1857 = vsyncpa [#allocation9], 1 }
 0x859   :  { %1858 = vsyncpa [#allocation12], 1 }
 0x85a   :  { %1859 = vsyncpa [#allocation4], 1 }

</bundles_post_ra>
